<compile_context>
chip_gen: v7x
topology: tpu7x:2x2x1
jax: 0.10.0
libtpu: 0.0.40
codegen_flags: <defaults>
</compile_context>

<pallas_src>
import jax
import jax.numpy as jnp
import numpy as np
from jax.experimental import pallas as pl
from jax.experimental.pallas import tpu as pltpu

_TILE_V = 256  # lane-dense vocab tile width for the fc projection (multiple of 128)


# ---------------------------------------------------------------------------
# Fused decoder-step kernel
# ---------------------------------------------------------------------------
def _make_decoder_kernel(n_layers: int, hidden_dim: int):
    H = hidden_dim

    def kernel(x_ref, h_in_ref, c_in_ref, w_ref, b_ref, fcw_ref, fcb_ref,
               pred_ref, h_out_ref, c_out_ref, xh_ref):
        step = pl.program_id(0)

        # Step 0: load the (bf16, zero-padded E->H) embedded tokens into the
        # low half of the [B, 2H] activation scratch.
        @pl.when(step == 0)
        def _():
            xh_ref[:, :H] = x_ref[...]

        # Steps [0, n_layers): one LSTM layer per grid step.
        @pl.when(step < n_layers)
        def _():
            xh_ref[:, H:] = h_in_ref[0].astype(xh_ref.dtype)
            # One matmul per layer: [B, 2H] @ [2H, 4H], f32 accumulation.
            gates = (
                jnp.dot(xh_ref[...], w_ref[0],
                        preferred_element_type=jnp.float32)
                + b_ref[0]
            )
            # PyTorch gate order: i, f, g, o (each slice 128-lane aligned).
            # i|f sigmoids fused into one contiguous EUP call.
            if_g = jax.nn.sigmoid(gates[:, 0 * H:2 * H])
            i_g = if_g[:, :H]
            f_g = if_g[:, H:]
            g_g = jnp.tanh(gates[:, 2 * H:3 * H])
            o_g = jax.nn.sigmoid(gates[:, 3 * H:4 * H])

            c_new = f_g * c_in_ref[0] + i_g * g_g
            h_new = o_g * jnp.tanh(c_new)

            c_out_ref[0] = c_new.astype(c_out_ref.dtype)
            h_out_ref[0] = h_new.astype(h_out_ref.dtype)
            # Feed the next layer (or the fc projection).
            xh_ref[:, :H] = h_new.astype(xh_ref.dtype)

        # Steps [n_layers, n_layers + V_pad//TILE_V): one vocab tile each.
        @pl.when(step >= n_layers)
        def _():
            pred_ref[...] = (
                jnp.dot(xh_ref[:, :H], fcw_ref[...],
                        preferred_element_type=jnp.float32)
                + fcb_ref[...]
            ).astype(pred_ref.dtype)

    return kernel


# ---------------------------------------------------------------------------
# Decoder forward (single pallas_call)
# ---------------------------------------------------------------------------
def decoder_forward(params, tokens, hidden, cell):
    """tokens: [B] int32, hidden/cell: [n_layers, B, H].

    Returns (prediction [B, V], hidden [n_layers, B, H], cell [n_layers, B, H]).
    """
    n_layers, B, H = hidden.shape
    vocab = params["embedding"].shape[0]
    v_pad = params["fc_w_t"].shape[1]
    n_vtiles = v_pad // _TILE_V

    # Embedding lookup (plain-JAX glue) -> [B, H] bf16; dropout = identity (eval).
    x = params["embedding"][tokens]

    def layer_idx(i):
        return jnp.minimum(i, n_layers - 1)

    def vtile_idx(i):
        return jnp.maximum(i - n_layers, 0)

    grid_spec = pltpu.PrefetchScalarGridSpec(
        num_scalar_prefetch=0,
        grid=(n_layers + n_vtiles,),
        in_specs=[
            pl.BlockSpec((B, H), lambda i: (0, 0)),                           # x_emb
            pl.BlockSpec((1, B, H), lambda i: (layer_idx(i), 0, 0)),          # h
            pl.BlockSpec((1, B, H), lambda i: (layer_idx(i), 0, 0)),          # c
            pl.BlockSpec((1, 2 * H, 4 * H), lambda i: (layer_idx(i), 0, 0)),  # W stacked
            pl.BlockSpec((1, 1, 4 * H), lambda i: (layer_idx(i), 0, 0)),      # b stacked
            pl.BlockSpec((H, _TILE_V), lambda i: (0, vtile_idx(i))),          # fc W tile
            pl.BlockSpec((1, _TILE_V), lambda i: (0, vtile_idx(i))),          # fc b tile
        ],
        out_specs=[
            pl.BlockSpec((B, _TILE_V), lambda i: (0, vtile_idx(i))),          # prediction
            pl.BlockSpec((1, B, H), lambda i: (layer_idx(i), 0, 0)),          # h_out
            pl.BlockSpec((1, B, H), lambda i: (layer_idx(i), 0, 0)),          # c_out
        ],
        scratch_shapes=[pltpu.VMEM((B, 2 * H), jnp.bfloat16)],
    )

    pred_pad, h_new, c_new = pl.pallas_call(
        _make_decoder_kernel(n_layers, H),
        grid_spec=grid_spec,
        out_shape=(
            jax.ShapeDtypeStruct((B, v_pad), jnp.float32),
            jax.ShapeDtypeStruct((n_layers, B, H), jnp.float32),
            jax.ShapeDtypeStruct((n_layers, B, H), jnp.float32),
        ),
        # Update hidden/cell state in place (XLA inserts a copy if the caller
        # still needs the old buffers).
        input_output_aliases={1: 1, 2: 2},
        compiler_params=pltpu.CompilerParams(
            dimension_semantics=("arbitrary",)),
    )(x, hidden, cell, params["w_stacked"], params["b_stacked"],
      params["fc_w_t"], params["fc_b"])

    return pred_pad[:, :vocab], h_new, c_new


# ---------------------------------------------------------------------------
# Pure-JAX reference (same bf16-weight / f32-math recipe as the kernel)
# ---------------------------------------------------------------------------
def reference_forward(params, tokens, hidden, cell):
    n_layers, _, H = hidden.shape
    vocab = params["embedding"].shape[0]
    x = params["embedding"][tokens]                                  # [B, H] bf16
    h_out, c_out = [], []
    for l in range(n_layers):
        xh = jnp.concatenate([x, hidden[l].astype(jnp.bfloat16)], axis=-1)
        gates = jnp.dot(xh, params["w_stacked"][l],
                        preferred_element_type=jnp.float32) + params["b_stacked"][l]
        i_g = jax.nn.sigmoid(gates[:, 0 * H:1 * H])
        f_g = jax.nn.sigmoid(gates[:, 1 * H:2 * H])
        g_g = jnp.tanh(gates[:, 2 * H:3 * H])
        o_g = jax.nn.sigmoid(gates[:, 3 * H:4 * H])
        c_new = f_g * cell[l] + i_g * g_g
        h_new = o_g * jnp.tanh(c_new)
        h_out.append(h_new)
        c_out.append(c_new)
        x = h_new.astype(jnp.bfloat16)
    pred = (jnp.dot(x, params["fc_w_t"], preferred_element_type=jnp.float32)
            + params["fc_b"])
    return pred[:, :vocab], jnp.stack(h_out), jnp.stack(c_out)


# ---------------------------------------------------------------------------
# Deterministic parameter init (PyTorch-style uniform), Pallas-friendly layout
# ---------------------------------------------------------------------------
def _round_up(x, m):
    return (x + m - 1) // m * m


def init_params(key, output_dim, embedding_dim, hidden_dim, n_layers):
    E, H, V = embedding_dim, hidden_dim, output_dim
    assert E <= H, "layer-0 input is zero-padded up to hidden_dim"
    assert H % 128 == 0, "hidden_dim must be lane-aligned"
    v_pad = _round_up(V, _TILE_V)

    keys = jax.random.split(key, 3 + 4 * n_layers)
    k = iter(keys)
    bound = 1.0 / np.sqrt(H)

    params = {}
    emb = jax.random.normal(next(k), (V, E), dtype=jnp.float32)
    params["embedding"] = jnp.pad(emb, ((0, 0), (0, H - E))).astype(jnp.bfloat16)

    w_layers, b_layers = [], []
    for layer in range(n_layers):
        in_dim = E if layer == 0 else H
        w_ih = jax.random.uniform(next(k), (4 * H, in_dim),
                                  minval=-bound, maxval=bound, dtype=jnp.float32)
        w_hh = jax.random.uniform(next(k), (4 * H, H),
                                  minval=-bound, maxval=bound, dtype=jnp.float32)
        b_ih = jax.random.uniform(next(k), (4 * H,),
                                  minval=-bound, maxval=bound, dtype=jnp.float32)
        b_hh = jax.random.uniform(next(k), (4 * H,),
                                  minval=-bound, maxval=bound, dtype=jnp.float32)
        # One combined weight per layer: [x_pad(H); h(H)] @ [[W_ih_t; 0]; W_hh_t]
        w_ih_t = jnp.pad(w_ih.T, ((0, H - in_dim), (0, 0)))          # [H, 4H]
        w_layers.append(jnp.concatenate([w_ih_t, w_hh.T], axis=0))   # [2H, 4H]
        b_layers.append((b_ih + b_hh)[None, :])                      # [1, 4H]
    params["w_stacked"] = jnp.stack(w_layers, axis=0).astype(jnp.bfloat16)  # [NL,2H,4H]
    params["b_stacked"] = jnp.stack(b_layers, axis=0)                       # [NL,1,4H] f32

    fc_w = jax.random.uniform(next(k), (V, H), minval=-bound, maxval=bound,
                              dtype=jnp.float32)
    fc_b = jax.random.uniform(next(k), (V,), minval=-bound, maxval=bound,
                              dtype=jnp.float32)
    params["fc_w_t"] = jnp.pad(fc_w.T, ((0, 0), (0, v_pad - V))).astype(jnp.bfloat16)
    params["fc_b"] = jnp.pad(fc_b, (0, v_pad - V))[None, :]                 # [1, V_pad]
    return params


if __name__ == "__main__":
    # Small, lane-friendly shapes consistent with the module.
    batch = 8
    embedding_dim = 96
    hidden_dim_s = 256     # multiple of 128 -> lane-dense gate slices
    n_layers = 2
    output_dim = 200       # synthetic vocab (padded to 256 internally)

    key = jax.random.PRNGKey(0)
    k_params, k_tok, k_h, k_c = jax.random.split(key, 4)

    params = init_params(k_params, output_dim, embedding_dim, hidden_dim_s, n_layers)

    tokens = jax.random.randint(k_tok, (batch,), 0, output_dim, dtype=jnp.int32)
    hidden = jax.random.normal(k_h, (n_layers, batch, hidden_dim_s), dtype=jnp.float32)
    cell = jax.random.normal(k_c, (n_layers, batch, hidden_dim_s), dtype=jnp.float32)

    fwd = jax.jit(decoder_forward)
    prediction, new_hidden, new_cell = fwd(params, tokens, hidden, cell)
    jax.block_until_ready((prediction, new_hidden, new_cell))

    assert prediction.shape == (batch, output_dim)
    assert new_hidden.shape == (n_layers, batch, hidden_dim_s)
    assert new_cell.shape == (n_layers, batch, hidden_dim_s)

    # Correctness check against the pure-JAX reference.
    ref_pred, ref_h, ref_c = jax.jit(reference_forward)(params, tokens, hidden, cell)
    np.testing.assert_allclose(np.asarray(prediction), np.asarray(ref_pred),
                               rtol=2e-2, atol=2e-2)
    np.testing.assert_allclose(np.asarray(new_hidden), np.asarray(ref_h),
                               rtol=2e-2, atol=2e-2)
    np.testing.assert_allclose(np.asarray(new_cell), np.asarray(ref_c),
                               rtol=2e-2, atol=2e-2)

    print("KERNEL_OK")
</pallas_src>

<mosaic_0001>
module attributes {stable_mosaic.version = 11 : i64} {
  func.func @kernel(%arg0: i32, %arg1: memref<8x256xbf16, #tpu.memory_space<vmem>>, %arg2: memref<1x8x256xf32, #tpu.memory_space<vmem>>, %arg3: memref<1x8x256xf32, #tpu.memory_space<vmem>>, %arg4: memref<1x512x1024xbf16, #tpu.memory_space<vmem>>, %arg5: memref<1x1x1024xf32, #tpu.memory_space<vmem>>, %arg6: memref<256x256xbf16, #tpu.memory_space<vmem>>, %arg7: memref<1x256xf32, #tpu.memory_space<vmem>>, %arg8: memref<8x256xf32, #tpu.memory_space<vmem>>, %arg9: memref<1x8x256xf32, #tpu.memory_space<vmem>>, %arg10: memref<1x8x256xf32, #tpu.memory_space<vmem>>, %arg11: memref<8x512xbf16, #tpu.memory_space<vmem>>) attributes {dimension_semantics = [#tpu.dimension_semantics<arbitrary>], iteration_bounds = array<i64: 3>, scalar_prefetch = 0 : i64, scratch_operands = 1 : i64, tpu.core_type = #tpu.core_type<tc>, window_params = [{pipeline_mode = #tpu.pipeline_mode<synchronous>, transform_indices = @transform_0, window_bounds = array<i64: 8, 256>}, {transform_indices = @transform_1, window_bounds = array<i64: 1, 8, 256>}, {transform_indices = @transform_2, window_bounds = array<i64: 1, 8, 256>}, {transform_indices = @transform_3, window_bounds = array<i64: 1, 512, 1024>}, {transform_indices = @transform_4, window_bounds = array<i64: 1, 1, 1024>}, {transform_indices = @transform_5, window_bounds = array<i64: 256, 256>}, {transform_indices = @transform_6, window_bounds = array<i64: 1, 256>}, {transform_indices = @transform_7, window_bounds = array<i64: 8, 256>}, {transform_indices = @transform_8, window_bounds = array<i64: 1, 8, 256>}, {transform_indices = @transform_9, window_bounds = array<i64: 1, 8, 256>}]} {
    %c0_i32 = arith.constant 0 : i32
    %0 = arith.cmpi eq, %arg0, %c0_i32 : i32
    %1 = arith.extui %0 : i1 to i32
    %c0_i32_0 = arith.constant 0 : i32
    %2 = arith.cmpi ne, %1, %c0_i32_0 : i32
    scf.if %2 {
      %c0 = arith.constant 0 : index
      %c0_4 = arith.constant 0 : index
      %9 = vector.load %arg1[%c0, %c0_4] : memref<8x256xbf16, #tpu.memory_space<vmem>>, vector<8x256xbf16>
      %c0_5 = arith.constant 0 : index
      %c0_6 = arith.constant 0 : index
      %10 = vector.load %arg11[%c0_5, %c0_6] : memref<8x512xbf16, #tpu.memory_space<vmem>>, vector<8x256xbf16>
      tpu.vector_store %arg11[%c0_5, %c0_6], %9 {strides = array<i32>} : memref<8x512xbf16, #tpu.memory_space<vmem>>, vector<8x256xbf16>,
    } else {
    }
    %c2_i32 = arith.constant 2 : i32
    %3 = arith.cmpi slt, %arg0, %c2_i32 : i32
    %4 = arith.extui %3 : i1 to i32
    %c0_i32_1 = arith.constant 0 : i32
    %5 = arith.cmpi ne, %4, %c0_i32_1 : i32
    scf.if %5 {
      %c0 = arith.constant 0 : index
      %c0_4 = arith.constant 0 : index
      %c0_5 = arith.constant 0 : index
      %9 = vector.load %arg2[%c0, %c0_4, %c0_5] : memref<1x8x256xf32, #tpu.memory_space<vmem>>, vector<1x8x256xf32>
      %10 = vector.shape_cast %9 : vector<1x8x256xf32> to vector<8x256xf32>
      %11 = arith.truncf %10 : vector<8x256xf32> to vector<8x256xbf16>
      %c0_6 = arith.constant 0 : index
      %c256 = arith.constant 256 : index
      %12 = vector.load %arg11[%c0_6, %c256] : memref<8x512xbf16, #tpu.memory_space<vmem>>, vector<8x256xbf16>
      tpu.vector_store %arg11[%c0_6, %c256], %11 {strides = array<i32>} : memref<8x512xbf16, #tpu.memory_space<vmem>>, vector<8x256xbf16>,
      %c0_7 = arith.constant 0 : index
      %c0_8 = arith.constant 0 : index
      %13 = vector.load %arg11[%c0_7, %c0_8] : memref<8x512xbf16, #tpu.memory_space<vmem>>, vector<8x512xbf16>
      %c0_9 = arith.constant 0 : index
      %c0_10 = arith.constant 0 : index
      %c0_11 = arith.constant 0 : index
      %14 = vector.load %arg4[%c0_9, %c0_10, %c0_11] : memref<1x512x1024xbf16, #tpu.memory_space<vmem>>, vector<1x512x1024xbf16>
      %15 = vector.shape_cast %14 : vector<1x512x1024xbf16> to vector<512x1024xbf16>
      %cst = arith.constant dense<0.000000e+00> : vector<8x1024xf32>
      %16 = tpu.matmul %13, %15, %cst {dimension_numbers = #tpu.dot_dimension_numbers<[1], [0], [0], [1], [0, 0, 1, 1], [], []>} : vector<8x512xbf16>, vector<512x1024xbf16>, vector<8x1024xf32> -> vector<8x1024xf32>
      %c0_12 = arith.constant 0 : index
      %c0_13 = arith.constant 0 : index
      %c0_14 = arith.constant 0 : index
      %17 = vector.load %arg5[%c0_12, %c0_13, %c0_14] : memref<1x1x1024xf32, #tpu.memory_space<vmem>>, vector<1x1x1024xf32>
      %18 = vector.shape_cast %17 : vector<1x1x1024xf32> to vector<1x1024xf32>
      %19 = vector.broadcast %18 : vector<1x1024xf32> to vector<8x1024xf32>
      %20 = arith.addf %16, %19 : vector<8x1024xf32>
      %21 = vector.extract_strided_slice %20 {offsets = [0, 0], sizes = [8, 512], strides = [1, 1]} : vector<8x1024xf32> to vector<8x512xf32>
      %22 = arith.negf %21 : vector<8x512xf32>
      %23 = math.exp %22 : vector<8x512xf32>
      %cst_15 = arith.constant 1.000000e+00 : f32
      %24 = vector.broadcast %cst_15 : f32 to vector<8x512xf32>
      %25 = arith.addf %24, %23 : vector<8x512xf32>
      %26 = arith.divf %24, %25 : vector<8x512xf32>
      %27 = vector.extract_strided_slice %26 {offsets = [0, 0], sizes = [8, 256], strides = [1, 1]} : vector<8x512xf32> to vector<8x256xf32>
      %28 = vector.extract_strided_slice %26 {offsets = [0, 256], sizes = [8, 256], strides = [1, 1]} : vector<8x512xf32> to vector<8x256xf32>
      %29 = vector.extract_strided_slice %20 {offsets = [0, 512], sizes = [8, 256], strides = [1, 1]} : vector<8x1024xf32> to vector<8x256xf32>
      %30 = math.tanh %29 : vector<8x256xf32>
      %31 = vector.extract_strided_slice %20 {offsets = [0, 768], sizes = [8, 256], strides = [1, 1]} : vector<8x1024xf32> to vector<8x256xf32>
      %32 = arith.negf %31 : vector<8x256xf32>
      %33 = math.exp %32 : vector<8x256xf32>
      %cst_16 = arith.constant 1.000000e+00 : f32
      %34 = vector.broadcast %cst_16 : f32 to vector<8x256xf32>
      %35 = arith.addf %34, %33 : vector<8x256xf32>
      %36 = arith.divf %34, %35 : vector<8x256xf32>
      %c0_17 = arith.constant 0 : index
      %c0_18 = arith.constant 0 : index
      %c0_19 = arith.constant 0 : index
      %37 = vector.load %arg3[%c0_17, %c0_18, %c0_19] : memref<1x8x256xf32, #tpu.memory_space<vmem>>, vector<1x8x256xf32>
      %38 = vector.shape_cast %37 : vector<1x8x256xf32> to vector<8x256xf32>
      %39 = arith.mulf %28, %38 : vector<8x256xf32>
      %40 = arith.mulf %27, %30 : vector<8x256xf32>
      %41 = arith.addf %39, %40 : vector<8x256xf32>
      %42 = math.tanh %41 : vector<8x256xf32>
      %43 = arith.mulf %36, %42 : vector<8x256xf32>
      %c0_20 = arith.constant 0 : index
      %c0_21 = arith.constant 0 : index
      %c0_22 = arith.constant 0 : index
      %44 = vector.load %arg10[%c0_20, %c0_21, %c0_22] : memref<1x8x256xf32, #tpu.memory_space<vmem>>, vector<1x8x256xf32>
      %45 = vector.shape_cast %44 : vector<1x8x256xf32> to vector<8x256xf32>
      %46 = vector.shape_cast %41 : vector<8x256xf32> to vector<1x8x256xf32>
      tpu.vector_store %arg10[%c0_20, %c0_21, %c0_22], %46 {strides = array<i32>} : memref<1x8x256xf32, #tpu.memory_space<vmem>>, vector<1x8x256xf32>,
      %c0_23 = arith.constant 0 : index
      %c0_24 = arith.constant 0 : index
      %c0_25 = arith.constant 0 : index
      %47 = vector.load %arg9[%c0_23, %c0_24, %c0_25] : memref<1x8x256xf32, #tpu.memory_space<vmem>>, vector<1x8x256xf32>
      %48 = vector.shape_cast %47 : vector<1x8x256xf32> to vector<8x256xf32>
      %49 = vector.shape_cast %43 : vector<8x256xf32> to vector<1x8x256xf32>
      tpu.vector_store %arg9[%c0_23, %c0_24, %c0_25], %49 {strides = array<i32>} : memref<1x8x256xf32, #tpu.memory_space<vmem>>, vector<1x8x256xf32>,
      %50 = arith.truncf %43 : vector<8x256xf32> to vector<8x256xbf16>
      %c0_26 = arith.constant 0 : index
      %c0_27 = arith.constant 0 : index
      %51 = vector.load %arg11[%c0_26, %c0_27] : memref<8x512xbf16, #tpu.memory_space<vmem>>, vector<8x256xbf16>
      tpu.vector_store %arg11[%c0_26, %c0_27], %50 {strides = array<i32>} : memref<8x512xbf16, #tpu.memory_space<vmem>>, vector<8x256xbf16>,
    } else {
    }
    %c2_i32_2 = arith.constant 2 : i32
    %6 = arith.cmpi sge, %arg0, %c2_i32_2 : i32
    %7 = arith.extui %6 : i1 to i32
    %c0_i32_3 = arith.constant 0 : i32
    %8 = arith.cmpi ne, %7, %c0_i32_3 : i32
    scf.if %8 {
      %c0 = arith.constant 0 : index
      %c0_4 = arith.constant 0 : index
      %9 = vector.load %arg11[%c0, %c0_4] : memref<8x512xbf16, #tpu.memory_space<vmem>>, vector<8x256xbf16>
      %c0_5 = arith.constant 0 : index
      %c0_6 = arith.constant 0 : index
      %10 = vector.load %arg6[%c0_5, %c0_6] : memref<256x256xbf16, #tpu.memory_space<vmem>>, vector<256x256xbf16>
      %cst = arith.constant dense<0.000000e+00> : vector<8x256xf32>
      %11 = tpu.matmul %9, %10, %cst {dimension_numbers = #tpu.dot_dimension_numbers<[1], [0], [0], [1], [0, 0, 1, 1], [], []>} : vector<8x256xbf16>, vector<256x256xbf16>, vector<8x256xf32> -> vector<8x256xf32>
      %c0_7 = arith.constant 0 : index
      %c0_8 = arith.constant 0 : index
      %12 = vector.load %arg7[%c0_7, %c0_8] : memref<1x256xf32, #tpu.memory_space<vmem>>, vector<1x256xf32>
      %13 = vector.broadcast %12 : vector<1x256xf32> to vector<8x256xf32>
      %14 = arith.addf %11, %13 : vector<8x256xf32>
      %c0_9 = arith.constant 0 : index
      %c0_10 = arith.constant 0 : index
      %15 = vector.load %arg8[%c0_9, %c0_10] : memref<8x256xf32, #tpu.memory_space<vmem>>, vector<8x256xf32>
      tpu.vector_store %arg8[%c0_9, %c0_10], %14 {strides = array<i32>} : memref<8x256xf32, #tpu.memory_space<vmem>>, vector<8x256xf32>,
    } else {
    }
    return
  }
  func.func @transform_0(%arg0: i32) -> (i32, i32) {
    %c0_i32 = arith.constant 0 : i32
    %c0_i32_0 = arith.constant 0 : i32
    %c0_i32_1 = arith.constant 0 : i32
    return %c0_i32, %c0_i32_0 : i32, i32
  }
  func.func @transform_1(%arg0: i32) -> (i32, i32, i32) {
    %c1_i32 = arith.constant 1 : i32
    %0 = arith.minsi %arg0, %c1_i32 : i32
    %c0_i32 = arith.constant 0 : i32
    %c0_i32_0 = arith.constant 0 : i32
    %c0_i32_1 = arith.constant 0 : i32
    return %0, %c0_i32, %c0_i32_0 : i32, i32, i32
  }
  func.func @transform_2(%arg0: i32) -> (i32, i32, i32) {
    %c1_i32 = arith.constant 1 : i32
    %0 = arith.minsi %arg0, %c1_i32 : i32
    %c0_i32 = arith.constant 0 : i32
    %c0_i32_0 = arith.constant 0 : i32
    %c0_i32_1 = arith.constant 0 : i32
    return %0, %c0_i32, %c0_i32_0 : i32, i32, i32
  }
  func.func @transform_3(%arg0: i32) -> (i32, i32, i32) {
    %c1_i32 = arith.constant 1 : i32
    %0 = arith.minsi %arg0, %c1_i32 : i32
    %c0_i32 = arith.constant 0 : i32
    %c0_i32_0 = arith.constant 0 : i32
    %c0_i32_1 = arith.constant 0 : i32
    return %0, %c0_i32, %c0_i32_0 : i32, i32, i32
  }
  func.func @transform_4(%arg0: i32) -> (i32, i32, i32) {
    %c1_i32 = arith.constant 1 : i32
    %0 = arith.minsi %arg0, %c1_i32 : i32
    %c0_i32 = arith.constant 0 : i32
    %c0_i32_0 = arith.constant 0 : i32
    %c0_i32_1 = arith.constant 0 : i32
    return %0, %c0_i32, %c0_i32_0 : i32, i32, i32
  }
  func.func @transform_5(%arg0: i32) -> (i32, i32) {
    %c2_i32 = arith.constant 2 : i32
    %0 = arith.subi %arg0, %c2_i32 : i32
    %c0_i32 = arith.constant 0 : i32
    %1 = arith.maxsi %0, %c0_i32 : i32
    %c0_i32_0 = arith.constant 0 : i32
    %c0_i32_1 = arith.constant 0 : i32
    return %c0_i32_0, %1 : i32, i32
  }
  func.func @transform_6(%arg0: i32) -> (i32, i32) {
    %c2_i32 = arith.constant 2 : i32
    %0 = arith.subi %arg0, %c2_i32 : i32
    %c0_i32 = arith.constant 0 : i32
    %1 = arith.maxsi %0, %c0_i32 : i32
    %c0_i32_0 = arith.constant 0 : i32
    %c0_i32_1 = arith.constant 0 : i32
    return %c0_i32_0, %1 : i32, i32
  }
  func.func @transform_7(%arg0: i32) -> (i32, i32) {
    %c2_i32 = arith.constant 2 : i32
    %0 = arith.subi %arg0, %c2_i32 : i32
    %c0_i32 = arith.constant 0 : i32
    %1 = arith.maxsi %0, %c0_i32 : i32
    %c0_i32_0 = arith.constant 0 : i32
    %c0_i32_1 = arith.constant 0 : i32
    return %c0_i32_0, %1 : i32, i32
  }
  func.func @transform_8(%arg0: i32) -> (i32, i32, i32) {
    %c1_i32 = arith.constant 1 : i32
    %0 = arith.minsi %arg0, %c1_i32 : i32
    %c0_i32 = arith.constant 0 : i32
    %c0_i32_0 = arith.constant 0 : i32
    %c0_i32_1 = arith.constant 0 : i32
    return %0, %c0_i32, %c0_i32_0 : i32, i32, i32
  }
  func.func @transform_9(%arg0: i32) -> (i32, i32, i32) {
    %c1_i32 = arith.constant 1 : i32
    %0 = arith.minsi %arg0, %c1_i32 : i32
    %c0_i32 = arith.constant 0 : i32
    %c0_i32_0 = arith.constant 0 : i32
    %c0_i32_1 = arith.constant 0 : i32
    return %0, %c0_i32, %c0_i32_0 : i32, i32, i32
  }
}

</mosaic_0001>

<bundles_post_ra>
// kernel: decoder_forward.1
= control target key start
LH: loop header
LB: loop body
LE: loop exit
PB: predicated region body
PF: predicated region fallthrough
CT: control target
= control target key end

     0   :  { %s4735_s0 = inlined_call_operand.vmem [shape: bf16[8,256], index: 0, kind: input, shape index: {}]   ;;  %s4736_s1 = inlined_call_operand.vmem [shape: f32[2,8,256], index: 1, kind: input, shape index: {}, may-alias: {1,8}]   ;;  %s4737_s2 = inlined_call_operand.vmem [shape: f32[2,8,256], index: 2, kind: input, shape index: {}, may-alias: {2,9}]   ;;  %s4738_s3 = inlined_call_operand.hbm [shape: bf16[2,512,1024], index: 3, kind: input, shape index: {}]   ;;  %s4739_s4 = inlined_call_operand.hbm [shape: f32[2,1,1024], index: 4, kind: input, shape index: {}]   ;;  %s4740_s5 = inlined_call_operand.hbm [shape: bf16[256,256], index: 5, kind: input, shape index: {}]   ;;  %s4741_s6 = inlined_call_operand.hbm [shape: f32[1,256], index: 6, kind: input, shape index: {}]   ;;  %s4742_s7 = inlined_call_operand.hbm [shape: f32[8,256], index: 7, kind: output, shape index: {0}]   ;;  %s4743_s8 = inlined_call_operand.vmem [shape: f32[2,8,256], index: 8, kind: output, shape index: {1}, may-alias: {1,8}]   ;;  %s4744_s9 = inlined_call_operand.vmem [shape: f32[2,8,256], index: 9, kind: output, shape index: {2}, may-alias: {2,9}]  }
   0x1   :  { %4757 = sst [smem:[#allocation22_spill]] %s4735_s0 }
   0x2   :  { %4758 = sst [smem:[#allocation23_spill]] %s4738_s3 }
   0x3   :  { %4759 = sst [smem:[#allocation24_spill]] %s4739_s4 }
   0x4   :  { %4760 = sst [smem:[#allocation25_spill]] %s4740_s5 }
   0x5   :  { %4761 = sst [smem:[#allocation26_spill]] %s4741_s6 }
   0x6   :  { %4762 = sst [smem:[#allocation27_spill]] %s4742_s7 }
   0x7   :  { %4763 = sst [smem:[#allocation28_spill]] %s4743_s8 }
   0x8   :  { %4764 = sst [smem:[#allocation29_spill]] %s4744_s9 }
   0x9   :  { %15 = vsyncpa [#allocation4], 0 }
   0xa   :  { %17 = vsyncpa [#allocation4 + $0x1], 0 }
   0xb   :  { %18 = vsyncpa [#allocation7], 0 }
   0xc   :  { %20 = vsyncpa [#allocation7 + $0x1], 0 }
   0xd   :  { %21 = vsyncpa [#allocation10], 0 }
   0xe   :  { %23 = vsyncpa [#allocation10 + $0x1], 0 }
   0xf   :  { %24 = vsyncpa [#allocation5], 0 }
  0x10   :  { %26 = vsyncpa [#allocation5 + $0x1], 0  ;;  %s4003_s30 = smov 0   ;;  %s4005_s10 = smov 0  }
  0x11   :  { %s4007_s11 = smov 0   ;;  %s4009_s12 = smov 0  }
  0x12   :  { %s4011_s13 = smov 0   ;;  %s4013_s14 = smov 0  }
  0x13   :  { %s4015_s15 = smov 0  }
  0x14 LB: > { %4765 = sst [smem:[#allocation17_spill]] %s3934_s13  ;;  %s4037_s16 = sadd.s32 4294967295, %s3942_s15   ;;  %s3942_s15 = sphi %s4015_s15, %s4797_s15   ;;  %s3938_s14 = sphi %s4013_s14, %s4800_s14   ;;  %s3934_s13 = sphi %s4011_s13, %s4799_s13   ;;  %s3930_s12 = sphi %s4009_s12, %s4804_s12   ;;  %s3926_s11 = sphi %s4007_s11, %s4803_s11   ;;  %s3922_s10 = sphi %s4005_s10, %s4802_s10   ;;  %s3918_s30 = sphi %s4003_s30, %s4801_s30  }
  0x15   : > { %4766 = sst [smem:[#allocation18_spill]] %s3938_s14  ;;  %s4040_s17 = sadd.s32 1, %s3942_s15  }
  0x16   : > { %4767 = sst [smem:[#allocation19_spill]] %s4040_s17  ;;  %p117_p0 = scmp.lt.s32.totalorder %s3942_s15, 1 }
  0x17   : > { %p119_p1 = scmp.lt.s32.totalorder %s4040_s17, 1  ;;  %s124_s18 = sadd.s32 1, %s3938_s14 }
  0x18   : > { %p131_p2 = scmp.ne.s32.totalorder %s3938_s14, %s3934_s13  ;;  %p132_p3 = scmp.eq.s32.totalorder %s3942_s15, 0 }
  0x19   : > { %s4048_s19 = scalar_select %p117_p0, %s3942_s15, 1 }
  0x1a   : > { %s120_s20 = scalar_select %p119_p1, %s4040_s17, 1 }
  0x1b   : > { %p137_p4 = scmp.ne.s32.totalorder %s3934_s13, %s3930_s12  ;;  %p138_p5 = scmp.eq.s32.totalorder %s4037_s16, 0 }
  0x1c   : > { %s121_s21 = ssub.s32 %s4048_s19, %s120_s20  ;;  %p4057_p7 = por %p132_p3, %p131_p2 }
  0x1d   : > { %p122_p6 = scmp.eq.s32.totalorder %s121_s21, 0  ;;  %p4061_p8 = por %p138_p5, %p137_p4 }
  0x1e   : > { %s3152_s24 = sadd.s32 4294967294, %s4040_s17  ;;  %p193_p10 = scmp.ne.s32.totalorder %s3926_s11, %s3922_s10 }
  0x1f   : > { %s4769_s23 = scalar_select %p4061_p8, 1, 0 }
  0x20   : > { %s4067_s25 = scalar_select %p122_p6, %s3938_s14, %s124_s18  }
  0x21   : > { %p181_p9 = scmp.gt.s32.totalorder %s3152_s24, 0  ;;  %p4749_p11 = scmp.ne.s32.totalorder %s3922_s10, %s3918_s30 }
  0x22   : > { %4770 = sst [smem:[#allocation20_spill]] %s4067_s25  ;;  %p4078_p12 = por %p193_p10, %p132_p3 }
  0x23   : > { %s4806_s24 = smov (!%p181_p9, %s3152_s24), 0  ;;  %p4085_p13 = por %p4749_p11, %p138_p5 }
  0x24   : > { %p261_p0 = scmp.eq.s32.totalorder %s4037_s16, 2  ;;  %p4750_p1 = scmp.lt.s32.totalorder %s3942_s15, 3 }
  0x25   : > { %s4772_s28 = scalar_select %p4085_p13, 1, 0 }
  0x26   : > { %s4092_s29 = sand.u32 1, %s3938_s14   ;;  %p4094_p2 = por %p261_p0, %p193_p10 }
  0x27   : > { %p4103_p3 = pnand %p4750_p1, %p4057_p7  ;;  %s397_s21 = sand.u32 1, %s3942_s15  }
  0x28   : > { %s4773_s12 = scalar_select %p4094_p2, 1, 0 }
  0x29   : > { %s3162_s26 = sshll.u32 %s4092_s29, 3  ;;  %s3511_s25 = sshll.u32 %s4048_s19, 7 }
  0x2a   : > { %4774 = sst [smem:[#allocation21_spill]] %s4773_s12  ;;  %s401_s14 = scalar_lea.vmem [#allocation6], %s3162_s26 }
  0x2b   : > { %s411_s17 = sshll.u32 %s401_s14, 4  ;;  %s4776_s4 = sld [smem:[#allocation24_spill]]  ;;  %s4115_s17 = int_to_ptr.vmem [resolvable:$true] %s411_s17 }
  0x2c   : > { %s4117_s22 = scalar_lea.sflag [#allocation7], %s397_s21  ;;  %p3722_p5 = pneg %p4103_p3 }
  0x31   : > { %s4113_s9 = scalar_lea.hbm %s4776_s4, %s3511_s25  ;;  %s3725_s7 = scalar_lea.hbm %s4776_s4, 256 }
  0x32   : > { %s3720_s18 = scalar_lea.hbm %s4113_s9, 128  ;;  %p3726_p9 = scmp.lt.u32.totalorder %s4113_s9, %s4776_s4 }
  0x33   : > { %p3721_p4 = scmp.ne.s32.totalorder %s4113_s9, %s3720_s18  ;;  %p3727_p10 = scmp.lt.u32.totalorder %s3725_s7, %s3720_s18 }
  0x34   : > { %p3729_p11 = scmp.lt.u32.totalorder %s3720_s18, %s4113_s9 }
  0x35   : > { %p3723_p6 = pnand %p3722_p5, %p3721_p4  ;;  %p3728_p0 = por %p3727_p10, %p3726_p9 }
  0x37   : > { %p3724_p7 = pneg %p3723_p6  ;;  %p3730_p1 = por %p3729_p11, %p3728_p0 }
  0x39   : > { %p3731_p2 = pnand %p3730_p1, %p3724_p7 }
  0x3b   : > { %3734 = shalt.err (!%p3731_p2)
}
  0x3c   : > { %s3735_s21 = scalar_lea.vmem %s4115_s17, 128  ;;  %s3944_s14 = smov [#allocation6]  }
  0x3d   : > { %p3736_p4 = scmp.ne.s32.totalorder %s4115_s17, %s3735_s21  ;;  %s3740_s0 = sshll.u32 %s3944_s14, 4  ;;  %s3741_s0 = int_to_ptr.vmem [resolvable:$false] %s3740_s0 }
  0x3e   : > { %s3742_s25 = scalar_lea.vmem %s3741_s0, 256  ;;  %p3743_p8 = scmp.lt.s32.totalorder %s4115_s17, %s3741_s0 }
  0x3f   : > { %p3738_p6 = pnand %p3736_p4, %p3722_p5  ;;  %p3744_p9 = scmp.lt.s32.totalorder %s3742_s25, %s3735_s21 }
  0x41   : > { %p3739_p13 = pneg %p3738_p6  ;;  %p3745_p10 = por %p3744_p9, %p3743_p8 }
  0x43   : > { %p3746_p11 = pnand %p3745_p10, %p3739_p13 }
  0x45   : > { %3749 = shalt.err (!%p3746_p11)
}
  0x46   : > { %3561 = dma.hbm_to_vmem [thread:$0]  (!%p4103_p3), %s4113_s9, 128, %s4115_s17, %s4117_s22  }
  0x47   : > { %p4777_p1 = scmp.lt.s32.totalorder %s3942_s15, 3  ;;  %p3173_p13 = scmp.ge.s32.totalorder %s3942_s15, 1 }
  0x48   : > { %p462_p2 = scmp.lt.s32.totalorder %s3942_s15, 4  ;;  %s3510_s26 = sshll.u32 %s4048_s19, 15 }
  0x49   : > { %p4149_p8 = pnand %p4777_p1, %p4078_p12  ;;  %s4780_s3 = sld [smem:[#allocation23_spill]] }
  0x4a   : > { %p4155_p7 = pnand %p3173_p13, %p462_p2  ;;  %s4781_s25 = sshll.u32 %s4092_s29, 11 }
  0x4b   : > { %s378_s9 = scalar_lea.vmem [#allocation3], %s4781_s25  ;;  %s4170_s27 = sadd.s32 4294967294, %s3942_s15  }
  0x4c   : > { %s4779_s7 = scalar_select %p4155_p7, 1, 0 }
  0x4d   : > { %s387_s17 = sshll.u32 %s378_s9, 4  ;;  %s375_s4 = scalar_lea.sflag [#allocation4], %s4092_s29  ;;  %s4167_s17 = int_to_ptr.vmem [resolvable:$true] %s387_s17 }
  0x4f   : > { %s4163_s0 = scalar_lea.hbm %s4780_s3, %s3510_s26  ;;  %s3755_s21 = scalar_lea.hbm %s4780_s3, 65536 }
  0x50   : > { %s3750_s12 = scalar_lea.hbm %s4163_s0, 32768  ;;  %p3756_p6 = scmp.lt.u32.totalorder %s4163_s0, %s4780_s3 }
  0x51   : > { %p3751_p12 = scmp.ne.s32.totalorder %s4163_s0, %s3750_s12  ;;  %p3757_p9 = scmp.lt.u32.totalorder %s3755_s21, %s3750_s12 }
  0x52   : > { %p3759_p11 = scmp.lt.u32.totalorder %s3750_s12, %s4163_s0 }
  0x53   : > { %p3753_p0 = pnand %p3751_p12, %p3722_p5  ;;  %p3758_p10 = por %p3757_p9, %p3756_p6 }
  0x55   : > { %p3754_p4 = pneg %p3753_p0  ;;  %p3760_p1 = por %p3759_p11, %p3758_p10 }
  0x57   : > { %p3761_p13 = pnand %p3760_p1, %p3754_p4 }
  0x59   : > { %3764 = shalt.err (!%p3761_p13)
}
  0x5a   : > { %s3765_s25 = scalar_lea.vmem %s4167_s17, 32768  ;;  %s3945_s9 = smov [#allocation3]  }
  0x5b   : > { %p3766_p2 = scmp.ne.s32.totalorder %s4167_s17, %s3765_s25  ;;  %s3770_s19 = sshll.u32 %s3945_s9, 4  ;;  %s3771_s19 = int_to_ptr.vmem [resolvable:$false] %s3770_s19 }
  0x5c   : > { %s3772_s8 = scalar_lea.vmem %s3771_s19, 65536  ;;  %p3773_p7 = scmp.lt.s32.totalorder %s4167_s17, %s3771_s19 }
  0x5d   : > { %p3768_p12 = pnand %p3766_p2, %p3722_p5  ;;  %p3774_p6 = scmp.lt.s32.totalorder %s3772_s8, %s3765_s25 }
  0x5f   : > { %p3769_p0 = pneg %p3768_p12  ;;  %p3775_p9 = por %p3774_p6, %p3773_p7 }
  0x61   : > { %p3776_p10 = pnand %p3775_p9, %p3769_p0 }
  0x63   : > { %3779 = shalt.err (!%p3776_p10)
}
  0x64   : > { %s3946_s12 = smov 512   ;;  %s3947_s26 = smov 32  }
  0x65   : > { %3558 = dma.hbm_to_vmem [thread:$0]  (!%p4103_p3), %s4163_s0, 32768, %s4167_s17, %s375_s4, %s3946_s12, %s3946_s12, %s3947_s26  }
  0x66   : > { %p178_p5 = scmp.gt.s32.totalorder %s4170_s27, 0  ;;  %p267_p7 = scmp.eq.s32.totalorder %s4170_s27, 2 }
  0x67   : > { %s4201_s21 = sand.u32 1, %s3926_s11   ;;  %p4782_p4 = scmp.ne.s32.totalorder %s3922_s10, %s3918_s30 }
  0x68   : > { %s4808_s27 = smov (!%p178_p5, %s4170_s27), 0  ;;  %s3165_s25 = sshll.u32 %s4201_s21, 8 }
  0x69   : > { %p4209_p11 = por %p267_p7, %p4782_p4  ;;  %s183_s20 = ssub.s32 %s4808_s27, %s4806_s24 }
  0x6a   : > { %p184_p1 = scmp.eq.s32.totalorder %s183_s20, 0  ;;  %s3512_s4 = sshll.u32 %s4808_s27, 7 }
  0x6b   : > { %s4783_s14 = scalar_select %p4209_p11, 1, 0 }
  0x6c   : > { %s4784_s5 = sld [smem:[#allocation25_spill]]  ;;  %s422_s9 = scalar_lea.vmem [#allocation8], %s3165_s25 }
  0x6d   : > { %s432_s19 = sshll.u32 %s422_s9, 4  ;;  %s4785_s8 = sadd.s32 1, %s3926_s11  ;;  %s4227_s19 = int_to_ptr.vmem [resolvable:$true] %s432_s19 }
  0x6e   : > { %s4225_s12 = scalar_select %p184_p1, %s3926_s11, %s4785_s8  }
  0x6f   : > { %p3782_p13 = pneg %p4149_p8 }
  0x72   : > { %s4220_s17 = scalar_lea.hbm %s4784_s5, %s3512_s4  ;;  %s3785_s4 = scalar_lea.hbm %s4784_s5, 4096 }
  0x73   : > { %s3780_s26 = scalar_lea.hbm %s4220_s17, 4096  ;;  %p3786_p0 = scmp.lt.u32.totalorder %s4220_s17, %s4784_s5 }
  0x74   : > { %p3781_p3 = scmp.ne.s32.totalorder %s4220_s17, %s3780_s26  ;;  %p3787_p6 = scmp.lt.u32.totalorder %s3785_s4, %s3780_s26 }
  0x75   : > { %p3789_p10 = scmp.lt.u32.totalorder %s3780_s26, %s4220_s17 }
  0x76   : > { %p3783_p2 = pnand %p3782_p13, %p3781_p3  ;;  %p3788_p9 = por %p3787_p6, %p3786_p0 }
  0x78   : > { %p3784_p12 = pneg %p3783_p2  ;;  %p3790_p5 = por %p3789_p10, %p3788_p9 }
  0x7a   : > { %p3791_p7 = pnand %p3790_p5, %p3784_p12 }
  0x7c   : > { %3794 = shalt.err (!%p3791_p7)
}
  0x7d   : > { %s3795_s0 = scalar_lea.vmem %s4227_s19, 4096  ;;  %s3948_s9 = smov [#allocation8]  }
  0x7e   : > { %p3796_p4 = scmp.ne.s32.totalorder %s4227_s19, %s3795_s0  ;;  %s3800_s8 = sshll.u32 %s3948_s9, 4  ;;  %s3801_s8 = int_to_ptr.vmem [resolvable:$false] %s3800_s8 }
  0x7f   : > { %s3802_s24 = scalar_lea.vmem %s3801_s8, 8192  ;;  %p3803_p2 = scmp.lt.s32.totalorder %s4227_s19, %s3801_s8 }
  0x80   : > { %p3798_p1 = pnand %p3796_p4, %p3782_p13  ;;  %p3804_p0 = scmp.lt.s32.totalorder %s3802_s24, %s3795_s0 }
  0x82   : > { %p3799_p3 = pneg %p3798_p1  ;;  %p3805_p6 = por %p3804_p0, %p3803_p2 }
  0x84   : > { %p3806_p9 = pnand %p3805_p6, %p3799_p3 }
  0x86   : > { %3809 = shalt.err (!%p3806_p9)
}
  0x87   : > { %s3949_s26 = smov 128   ;;  %s3950_s20 = smov 8  }
  0x88   : > { %3564 = dma.hbm_to_vmem [thread:$0]  (!%p4149_p8), %s4220_s17, 4096, %s4227_s19, %s4117_s22, %s3949_s26, %s3949_s26, %s3950_s20  }
  0x89   : > { %s3169_s4 = sshll.u32 %s4201_s21, 1  ;;  %s3513_s29 = sshll.u32 %s4808_s27, 5 }
  0x8a   : > { %s4786_s6 = sld [smem:[#allocation26_spill]]  ;;  %s446_s8 = scalar_lea.vmem [#allocation9], %s3169_s4 }
  0x8b   : > { %s457_s24 = sshll.u32 %s446_s8, 4  ;;  %s443_s3 = scalar_lea.sflag [#allocation10], %s4201_s21  ;;  %s458_s24 = int_to_ptr.vmem [resolvable:$true] %s457_s24 }
  0x90   : > { %s4260_s0 = scalar_lea.hbm %s4786_s6, %s3513_s29  ;;  %s3815_s17 = scalar_lea.hbm %s4786_s6, 32 }
  0x91   : > { %s3810_s5 = scalar_lea.hbm %s4260_s0, 32  ;;  %p3816_p7 = scmp.lt.u32.totalorder %s4260_s0, %s4786_s6 }
  0x92   : > { %p3811_p12 = scmp.ne.s32.totalorder %s4260_s0, %s3810_s5  ;;  %p3817_p4 = scmp.lt.u32.totalorder %s3815_s17, %s3810_s5 }
  0x93   : > { %p3819_p3 = scmp.lt.u32.totalorder %s3810_s5, %s4260_s0 }
  0x94   : > { %p3813_p10 = pnand %p3811_p12, %p3782_p13  ;;  %p3818_p1 = por %p3817_p4, %p3816_p7 }
  0x96   : > { %p3814_p5 = pneg %p3813_p10  ;;  %p3820_p2 = por %p3819_p3, %p3818_p1 }
  0x98   : > { %p3821_p0 = pnand %p3820_p2, %p3814_p5 }
  0x9a   : > { %3824 = shalt.err (!%p3821_p0)
}
  0x9b   : > { %s3825_s21 = scalar_lea.vmem %s458_s24, 32  ;;  %s3951_s20 = smov [#allocation9]  }
  0x9c   : > { %p3826_p6 = scmp.ne.s32.totalorder %s458_s24, %s3825_s21  ;;  %s3830_s4 = sshll.u32 %s3951_s20, 4  ;;  %s3831_s4 = int_to_ptr.vmem [resolvable:$false] %s3830_s4 }
  0x9d   : > { %s3832_s29 = scalar_lea.vmem %s3831_s4, 64  ;;  %p3833_p10 = scmp.lt.s32.totalorder %s458_s24, %s3831_s4 }
  0x9e   : > { %p3828_p9 = pnand %p3826_p6, %p3782_p13  ;;  %p3834_p11 = scmp.lt.s32.totalorder %s3832_s29, %s3825_s21 }
  0xa0   : > { %p3829_p12 = pneg %p3828_p9  ;;  %p3835_p4 = por %p3834_p11, %p3833_p10 }
  0xa2   : > { %p3836_p7 = pnand %p3835_p4, %p3829_p12 }
  0xa4   : > { %3839 = shalt.err (!%p3836_p7)
}
  0xa5   : > { %3567 = dma.hbm_to_vmem [thread:$0]  (!%p4149_p8), %s4260_s0, 32, %s458_s24, %s443_s3  }
  0xa6   : > { %p4787_p5 = scmp.ne.s32.totalorder %s4779_s7, 0 }
  0xa7   : > { %s468_s5 = sand.u32 (!%p4787_p5), 1, %s3934_s13   ;;  %p4788_p13 = scmp.ne.s32.totalorder (!%p4787_p5), %s4769_s23, 0 }
  0xa8   : > { %466 = sbr.rel (%p4787_p5) target bundleno = 1020 (0x3fc), region = 48  ;;  %s3174_s25 = sshll.u32 (!%p4787_p5), %s468_s5, 11 }
  0xa9   : > { %s469_s9 = scalar_lea.sflag (!%p4787_p5), [#allocation4], %s468_s5  ;;  %s4285_s8 = scalar_lea.vmem (!%p4787_p5), [#allocation3], %s3174_s25 }
  0xaf   : > { %3897 = dma.done.wait (%p4788_p13), %s469_s9, 32768  }
  0xb0   : > { %3899 = vsyncadd (%p4788_p13), %s469_s9, 4294934528  ;;  %s477_s18 = sand.u32 1, %s4037_s16   ;;  %s3175_s22 = sshll.u32 %s468_s5, 3 }
  0xb1   : > { %s478_s3 = scalar_lea.sflag [#allocation7], %s477_s18  ;;  %s4292_s0 = scalar_lea.vmem [#allocation6], %s3175_s22 }
  0xb2   : > { %3901 = dma.done.wait (%p4788_p13), %s478_s3, 128  }
  0xb3   : > { %3903 = vsyncadd (%p4788_p13), %s478_s3, 4294967168  ;;  %s4299_s7 = sand.u32 1, %s3922_s10   ;;  %p4789_p8 = scmp.ne.s32.totalorder %s4772_s28, 0 }
  0xb4   : > { %s3176_s24 = sshll.u32 %s4299_s7, 8 }
  0xb5   : > { %s4302_s27 = scalar_lea.vmem [#allocation8], %s3176_s24 }
  0xb6   : > { %3905 = dma.done.wait (%p4789_p8), %s478_s3, 4096  }
  0xb7   : > { %3907 = vsyncadd (%p4789_p8), %s478_s3, 4294963200  ;;  %s3177_s17 = sshll.u32 %s4299_s7, 1  ;;  %s496_s19 = scalar_lea.sflag [#allocation10], %s4299_s7 }
  0xb8   : > { %s4310_s23 = scalar_lea.vmem [#allocation9], %s3177_s17 }
  0xb9   : > { %3909 = dma.done.wait (%p4789_p8), %s496_s19, 32  }
  0xba   : > { %3911 = vsyncadd (%p4789_p8), %s496_s19, 4294967264  ;;  %s3178_s26 = sshll.u32 %s4299_s7, 4  ;;  %p577_p11 = scmp.lt.s32.totalorder %s4037_s16, 1 }
  0xbb   : > { %s4790_s3 = sld [smem:[#allocation28_spill]]  ;;  %s4791_s6 = sld [smem:[#allocation29_spill]] }
  0xbc   : > { %s578_s21 = scalar_select %p577_p11, %s4037_s16, 1 }
  0xbd   : > { %p3199_p1 = scmp.ne.s32.totalorder %s4037_s16, 0 }
  0xbe   : > { %s4810_s21 = smov (!%p577_p11, %s578_s21), 1  ;;  %s4792_s25 = sld [smem:[#allocation22_spill]] (!%p3199_p1) }
  0xbf   : > { %s3514_s20 = sshll.u32 %s4810_s21, 4  ;;  %s4339_s21 = scalar_lea.vmem [#allocation11], %s3178_s26 }
  0xc0   : > { %s4322_s5 = scalar_lea.vmem %s4736_s1, %s3514_s20  ;;  %s4327_s18 = scalar_lea.vmem %s4737_s2, %s3514_s20 }
  0xc1   : > { %s4332_s24 = scalar_lea.vmem %s4790_s3, %s3514_s20  ;;  %s4337_s13 = scalar_lea.vmem %s4791_s6, %s3514_s20 }
  0xc2   : > { %632 = sbr.rel (%p3199_p1) target bundleno = 201 (0xc9), region = 68 }
  0xc4   : > { %v633_v0 = vld [vmem:[%s4792_s25] sm:$0xff] (!%p3199_p1) }
  0xc5   : > { %634 = vst [vmem:[#allocation2] sm:$0xff] (!%p3199_p1), %v633_v0 }
  0xc9 PF: > { %p3200_p3 = scmp.ge.s32.totalorder %s4037_s16, 2 }
  0xca   : > { %v652_v1 = vld [vmem:[%s4285_s8] sm:$0xff] (!%p3200_p3)  ;;  %v653_v3 = vld [vmem:[%s4285_s8 + $0x8] sm:$0xff] (!%p3200_p3) }
  0xcb   : > { %638 = sbr.rel (%p3200_p3) target bundleno = 710 (0x2c6), region = 72  ;;  %v656_v2 = vld [vmem:[%s4285_s8 + $0x20] sm:$0xff] (!%p3200_p3)  ;;  %v657_v5 = vld [vmem:[%s4285_s8 + $0x28] sm:$0xff] (!%p3200_p3) }
  0xcc   : > { %v3207_v4 = vcombine.high (!%p3200_p3), %v652_v1, %v656_v2  ;;  %v3206_v6 = vcombine.low (!%p3200_p3), %v652_v1, %v656_v2  ;;  %v660_v7 = vld [vmem:[%s4285_s8 + $0x40] sm:$0xff] (!%p3200_p3)  ;;  %v3209_v9 = vcombine.high (!%p3200_p3), %v653_v3, %v657_v5  ;;  %v3208_v10 = vcombine.low (!%p3200_p3), %v653_v3, %v657_v5  ;;  %v661_v12 = vld [vmem:[%s4285_s8 + $0x48] sm:$0xff] (!%p3200_p3)  ;;  %v4374_v54 = vld [vmem:[#allocation2] sm:$0xff] (!%p3200_p3) }
  0xcd   : > { %v664_v8 = vld [vmem:[%s4285_s8 + $0x60] sm:$0xff] (!%p3200_p3)  ;;  %v665_v13 = vld [vmem:[%s4285_s8 + $0x68] sm:$0xff] (!%p3200_p3)  ;;  %v4380_v58 = vcombine.high (!%p3200_p3), %v4374_v54, %v4374_v54 }
  0xce   : > { %v3215_v11 = vcombine.high (!%p3200_p3), %v660_v7, %v664_v8  ;;  %v668_v14 = vld [vmem:[%s4285_s8 + $0x80] sm:$0xff] (!%p3200_p3)  ;;  %2244 = vmatprep.subr.bf16.mxu0 (!%p3200_p3), %v3207_v4  ;;  %v3217_v15 = vcombine.high (!%p3200_p3), %v661_v12, %v665_v13  ;;  %v669_v17 = vld [vmem:[%s4285_s8 + $0x88] sm:$0xff] (!%p3200_p3)  ;;  %2326 = vmatprep.subr.bf16.mxu1 (!%p3200_p3), %v3209_v9  ;;  %v3214_v19 = vcombine.low (!%p3200_p3), %v660_v7, %v664_v8 }
  0xcf   : > { %v672_v16 = vld [vmem:[%s4285_s8 + $0xa0] sm:$0xff] (!%p3200_p3)  ;;  %v673_v18 = vld [vmem:[%s4285_s8 + $0xa8] sm:$0xff] (!%p3200_p3)  ;;  %2245 = vmatpush1.bf16.msra.mxu0 (!%p3200_p3), %v3206_v6  ;;  %2327 = vmatpush1.bf16.msra.mxu1 (!%p3200_p3), %v3208_v10  ;;  %v3216_v20 = vcombine.low (!%p3200_p3), %v661_v12, %v665_v13 }
  0xd0   : > { %2246 = vmatprep.subr.bf16.mxu0 (!%p3200_p3), %v3215_v11  ;;  %v3223_v21 = vcombine.high (!%p3200_p3), %v668_v14, %v672_v16  ;;  %2328 = vmatprep.subr.bf16.mxu1 (!%p3200_p3), %v3217_v15  ;;  %v3225_v22 = vcombine.high (!%p3200_p3), %v669_v17, %v673_v18  ;;  %v676_v23 = vld [vmem:[%s4285_s8 + $0xc0] sm:$0xff] (!%p3200_p3)  ;;  %v677_v25 = vld [vmem:[%s4285_s8 + $0xc8] sm:$0xff] (!%p3200_p3)  ;;  %v3222_v27 = vcombine.low (!%p3200_p3), %v668_v14, %v672_v16 }
  0xd1   : > { %v680_v24 = vld [vmem:[%s4285_s8 + $0xe0] sm:$0xff] (!%p3200_p3)  ;;  %v681_v26 = vld [vmem:[%s4285_s8 + $0xe8] sm:$0xff] (!%p3200_p3)  ;;  %v3224_v28 = vcombine.low (!%p3200_p3), %v669_v17, %v673_v18  ;;  %2276 = vmatprep.mubr.bf16.mxu0 (!%p3200_p3), %v4380_v58  ;;  %2358 = vmatprep.mubr.bf16.mxu1 (!%p3200_p3), %v4380_v58 }
  0xd2   : > { %v3231_v29 = vcombine.high %v676_v23, %v680_v24  ;;  %v3233_v30 = vcombine.high %v677_v25, %v681_v26  ;;  %v684_v31 = vld [vmem:[%s4285_s8 + $0x100] sm:$0xff]  ;;  %v685_v33 = vld [vmem:[%s4285_s8 + $0x108] sm:$0xff]  ;;  %v3230_v35 = vcombine.low %v676_v23, %v680_v24  ;;  %v3232_v36 = vcombine.low %v677_v25, %v681_v26 }
  0xd3   : > { %2247 = vmatpush1.bf16.msra.mxu0 %v3214_v19  ;;  %2329 = vmatpush1.bf16.msra.mxu1 %v3216_v20  ;;  %v688_v32 = vld [vmem:[%s4285_s8 + $0x120] sm:$0xff]  ;;  %v689_v34 = vld [vmem:[%s4285_s8 + $0x128] sm:$0xff] }
  0xd4   : > { %2248 = vmatprep.subr.bf16.mxu0 %v3223_v21  ;;  %2330 = vmatprep.subr.bf16.mxu1 %v3225_v22  ;;  %v3239_v37 = vcombine.high %v684_v31, %v688_v32  ;;  %v3241_v38 = vcombine.high %v685_v33, %v689_v34  ;;  %v692_v39 = vld [vmem:[%s4285_s8 + $0x140] sm:$0xff]  ;;  %v693_v41 = vld [vmem:[%s4285_s8 + $0x148] sm:$0xff]  ;;  %v3238_v43 = vcombine.low %v684_v31, %v688_v32 }
  0xd5   : > { %v696_v40 = vld [vmem:[%s4285_s8 + $0x160] sm:$0xff]  ;;  %v697_v42 = vld [vmem:[%s4285_s8 + $0x168] sm:$0xff]  ;;  %v3240_v44 = vcombine.low %v685_v33, %v689_v34 }
  0xd6   : > { %v3247_v45 = vcombine.high %v692_v39, %v696_v40  ;;  %v3249_v46 = vcombine.high %v693_v41, %v697_v42  ;;  %v700_v47 = vld [vmem:[%s4285_s8 + $0x180] sm:$0xff]  ;;  %v701_v49 = vld [vmem:[%s4285_s8 + $0x188] sm:$0xff]  ;;  %v3246_v51 = vcombine.low %v692_v39, %v696_v40  ;;  %v3248_v52 = vcombine.low %v693_v41, %v697_v42 }
  0xd7   : > { %2249 = vmatpush1.bf16.msra.mxu0 %v3222_v27  ;;  %2331 = vmatpush1.bf16.msra.mxu1 %v3224_v28  ;;  %v704_v48 = vld [vmem:[%s4285_s8 + $0x1a0] sm:$0xff]  ;;  %v705_v50 = vld [vmem:[%s4285_s8 + $0x1a8] sm:$0xff] }
  0xd8   : > { %2250 = vmatprep.subr.bf16.mxu0 %v3231_v29  ;;  %2332 = vmatprep.subr.bf16.mxu1 %v3233_v30  ;;  %v3255_v53 = vcombine.high %v700_v47, %v704_v48  ;;  %v3257_v55 = vcombine.high %v701_v49, %v705_v50  ;;  %v708_v56 = vld [vmem:[%s4285_s8 + $0x1c0] sm:$0xff]  ;;  %v709_v59 = vld [vmem:[%s4285_s8 + $0x1c8] sm:$0xff]  ;;  %v3254_v61 = vcombine.low %v700_v47, %v704_v48 }
  0xd9   : > { %v712_v57 = vld [vmem:[%s4285_s8 + $0x1e0] sm:$0xff]  ;;  %v713_v60 = vld [vmem:[%s4285_s8 + $0x1e8] sm:$0xff]  ;;  %v3256_v62 = vcombine.low %v701_v49, %v705_v50 }
  0xda   : > { %v3263_v63 = vcombine.high %v708_v56, %v712_v57  ;;  %v3265_v0 = vcombine.high %v709_v59, %v713_v60  ;;  %v716_v1 = vld [vmem:[%s4285_s8 + $0x200] sm:$0xff]  ;;  %v717_v3 = vld [vmem:[%s4285_s8 + $0x208] sm:$0xff]  ;;  %v3262_v5 = vcombine.low %v708_v56, %v712_v57  ;;  %v3264_v6 = vcombine.low %v709_v59, %v713_v60 }
  0xdb   : > { %2251 = vmatpush1.bf16.msra.mxu0 %v3230_v35  ;;  %2333 = vmatpush1.bf16.msra.mxu1 %v3232_v36  ;;  %v720_v2 = vld [vmem:[%s4285_s8 + $0x220] sm:$0xff]  ;;  %v721_v4 = vld [vmem:[%s4285_s8 + $0x228] sm:$0xff] }
  0xdc   : > { %2252 = vmatprep.subr.bf16.mxu0 %v3239_v37  ;;  %2334 = vmatprep.subr.bf16.mxu1 %v3241_v38  ;;  %v3271_v7 = vcombine.high %v716_v1, %v720_v2  ;;  %v3273_v8 = vcombine.high %v717_v3, %v721_v4  ;;  %v724_v9 = vld [vmem:[%s4285_s8 + $0x240] sm:$0xff]  ;;  %v725_v11 = vld [vmem:[%s4285_s8 + $0x248] sm:$0xff]  ;;  %v3270_v13 = vcombine.low %v716_v1, %v720_v2  ;;  %v4410_v38 = vld [vmem:[%s4322_s5 + $0x8] sm:$0xff] }
  0xdd   : > { %v728_v10 = vld [vmem:[%s4285_s8 + $0x260] sm:$0xff]  ;;  %v729_v12 = vld [vmem:[%s4285_s8 + $0x268] sm:$0xff]  ;;  %v3272_v14 = vcombine.low %v717_v3, %v721_v4 }
  0xde   : > { %v3279_v15 = vcombine.high %v724_v9, %v728_v10  ;;  %v3281_v16 = vcombine.high %v725_v11, %v729_v12  ;;  %v732_v17 = vld [vmem:[%s4285_s8 + $0x280] sm:$0xff]  ;;  %v733_v19 = vld [vmem:[%s4285_s8 + $0x288] sm:$0xff]  ;;  %v3278_v21 = vcombine.low %v724_v9, %v728_v10  ;;  %v3280_v22 = vcombine.low %v725_v11, %v729_v12 }
  0xdf   : > { %2253 = vmatpush1.bf16.msra.mxu0 %v3238_v43  ;;  %2335 = vmatpush1.bf16.msra.mxu1 %v3240_v44  ;;  %v736_v18 = vld [vmem:[%s4285_s8 + $0x2a0] sm:$0xff]  ;;  %v737_v20 = vld [vmem:[%s4285_s8 + $0x2a8] sm:$0xff] }
  0xe0   : > { %2254 = vmatprep.subr.bf16.mxu0 %v3247_v45  ;;  %2336 = vmatprep.subr.bf16.mxu1 %v3249_v46  ;;  %v3287_v23 = vcombine.high %v732_v17, %v736_v18  ;;  %v3289_v24 = vcombine.high %v733_v19, %v737_v20  ;;  %v740_v25 = vld [vmem:[%s4285_s8 + $0x2c0] sm:$0xff]  ;;  %v741_v27 = vld [vmem:[%s4285_s8 + $0x2c8] sm:$0xff]  ;;  %v3286_v29 = vcombine.low %v732_v17, %v736_v18 }
  0xe1   : > { %v744_v26 = vld [vmem:[%s4285_s8 + $0x2e0] sm:$0xff]  ;;  %v745_v28 = vld [vmem:[%s4285_s8 + $0x2e8] sm:$0xff]  ;;  %v3288_v30 = vcombine.low %v733_v19, %v737_v20 }
  0xe2   : > { %v3295_v31 = vcombine.high %v740_v25, %v744_v26  ;;  %v3297_v32 = vcombine.high %v741_v27, %v745_v28  ;;  %v748_v33 = vld [vmem:[%s4285_s8 + $0x300] sm:$0xff]  ;;  %v749_v35 = vld [vmem:[%s4285_s8 + $0x308] sm:$0xff]  ;;  %v3294_v39 = vcombine.low %v740_v25, %v744_v26  ;;  %v3296_v40 = vcombine.low %v741_v27, %v745_v28 }
  0xe3   : > { %2255 = vmatpush1.bf16.msra.mxu0 %v3246_v51  ;;  %2337 = vmatpush1.bf16.msra.mxu1 %v3248_v52  ;;  %v752_v34 = vld [vmem:[%s4285_s8 + $0x320] sm:$0xff]  ;;  %v753_v36 = vld [vmem:[%s4285_s8 + $0x328] sm:$0xff] }
  0xe4   : > { %2256 = vmatprep.subr.bf16.mxu0 %v3255_v53  ;;  %2338 = vmatprep.subr.bf16.mxu1 %v3257_v55  ;;  %v4407_v37 = vld [vmem:[%s4322_s5] sm:$0xff]  ;;  %v3303_v41 = vcombine.high %v748_v33, %v752_v34  ;;  %v3305_v42 = vcombine.high %v749_v35, %v753_v36  ;;  %v756_v43 = vld [vmem:[%s4285_s8 + $0x340] sm:$0xff]  ;;  %v3302_v47 = vcombine.low %v748_v33, %v752_v34 }
  0xe5   : > { %v760_v44 = vld [vmem:[%s4285_s8 + $0x360] sm:$0xff]  ;;  %v757_v45 = vld [vmem:[%s4285_s8 + $0x348] sm:$0xff]  ;;  %v3304_v48 = vcombine.low %v749_v35, %v753_v36 }
  0xe6   : > { %v761_v46 = vld [vmem:[%s4285_s8 + $0x368] sm:$0xff]  ;;  %v3311_v49 = vcombine.high %v756_v43, %v760_v44  ;;  %v764_v51 = vld [vmem:[%s4285_s8 + $0x380] sm:$0xff]  ;;  %v3310_v56 = vcombine.low %v756_v43, %v760_v44 }
  0xe7   : > { %2257 = vmatpush1.bf16.msra.mxu0 %v3254_v61  ;;  %2339 = vmatpush1.bf16.msra.mxu1 %v3256_v62  ;;  %v3313_v50 = vcombine.high %v757_v45, %v761_v46  ;;  %v768_v52 = vld [vmem:[%s4285_s8 + $0x3a0] sm:$0xff]  ;;  %v765_v53 = vld [vmem:[%s4285_s8 + $0x388] sm:$0xff]  ;;  %v3312_v57 = vcombine.low %v757_v45, %v761_v46 }
  0xe8   : > { %2258 = vmatprep.subr.bf16.mxu0 %v3263_v63  ;;  %2340 = vmatprep.subr.bf16.mxu1 %v3265_v0  ;;  %v769_v55 = vld [vmem:[%s4285_s8 + $0x3a8] sm:$0xff]  ;;  %v3319_v59 = vcombine.high %v764_v51, %v768_v52  ;;  %v772_v61 = vld [vmem:[%s4285_s8 + $0x3c0] sm:$0xff]  ;;  %v3318_v1 = vcombine.low %v764_v51, %v768_v52 }
  0xe9   : > { %v3321_v60 = vcombine.high %v765_v53, %v769_v55  ;;  %v776_v62 = vld [vmem:[%s4285_s8 + $0x3e0] sm:$0xff]  ;;  %v773_v63 = vld [vmem:[%s4285_s8 + $0x3c8] sm:$0xff]  ;;  %v3320_v2 = vcombine.low %v765_v53, %v769_v55 }
  0xea   : > { %v777_v0 = vld [vmem:[%s4285_s8 + $0x3e8] sm:$0xff]  ;;  %v3327_v3 = vcombine.high %v772_v61, %v776_v62  ;;  %v3326_v9 = vcombine.low %v772_v61, %v776_v62 }
  0xeb   : > { %2259 = vmatpush1.bf16.msra.mxu0 %v3262_v5  ;;  %2341 = vmatpush1.bf16.msra.mxu1 %v3264_v6  ;;  %v3329_v4 = vcombine.high %v773_v63, %v777_v0  ;;  %v780_v5 = vld [vmem:[%s4285_s8 + $0x400] sm:$0xff]  ;;  %v3328_v10 = vcombine.low %v773_v63, %v777_v0  ;;  %v793_v17 = vld [vmem:[%s4285_s8 + $0x468] sm:$0xff] }
  0xec   : > { %2260 = vmatprep.subr.bf16.mxu0 %v3271_v7  ;;  %2342 = vmatprep.subr.bf16.mxu1 %v3273_v8  ;;  %v784_v6 = vld [vmem:[%s4285_s8 + $0x420] sm:$0xff]  ;;  %v781_v7 = vld [vmem:[%s4285_s8 + $0x408] sm:$0xff] }
  0xed   : > { %v785_v8 = vld [vmem:[%s4285_s8 + $0x428] sm:$0xff]  ;;  %v3335_v11 = vcombine.high %v780_v5, %v784_v6  ;;  %v3334_v18 = vcombine.low %v780_v5, %v784_v6 }
  0xee   : > { %v3337_v12 = vcombine.high %v781_v7, %v785_v8  ;;  %v3336_v19 = vcombine.low %v781_v7, %v785_v8  ;;  %v801_v25 = vld [vmem:[%s4285_s8 + $0x4a8] sm:$0xff] }
  0xef   : > { %2261 = vmatpush1.bf16.msra.mxu0 %v3270_v13  ;;  %2343 = vmatpush1.bf16.msra.mxu1 %v3272_v14  ;;  %v788_v13 = vld [vmem:[%s4285_s8 + $0x440] sm:$0xff]  ;;  %v809_v33 = vld [vmem:[%s4285_s8 + $0x4e8] sm:$0xff] }
  0xf0   : > { %2262 = vmatprep.subr.bf16.mxu0 %v3279_v15  ;;  %2344 = vmatprep.subr.bf16.mxu1 %v3281_v16  ;;  %v792_v14 = vld [vmem:[%s4285_s8 + $0x460] sm:$0xff]  ;;  %v4432_v15 = vcombine.low %v4374_v54, %v4374_v54  ;;  %v789_v16 = vld [vmem:[%s4285_s8 + $0x448] sm:$0xff] }
  0xf1   : > { %v3343_v20 = vcombine.high %v788_v13, %v792_v14  ;;  %v797_v54 = vld [vmem:[%s4285_s8 + $0x488] sm:$0xff]  ;;  %v3342_v26 = vcombine.low %v788_v13, %v792_v14  ;;  %v3344_v27 = vcombine.low %v789_v16, %v793_v17 }
  0xf2   : > { %v3352_v35 = vcombine.low %v797_v54, %v801_v25 }
  0xf3   : > { %2263 = vmatpush1.bf16.msra.mxu0 %v3278_v21  ;;  %2345 = vmatpush1.bf16.msra.mxu1 %v3280_v22  ;;  %v3345_v21 = vcombine.high %v789_v16, %v793_v17  ;;  %v796_v22 = vld [vmem:[%s4285_s8 + $0x480] sm:$0xff] }
  0xf4   : > { %2264 = vmatprep.subr.bf16.mxu0 %v3287_v23  ;;  %2346 = vmatprep.subr.bf16.mxu1 %v3289_v24  ;;  %v800_v23 = vld [vmem:[%s4285_s8 + $0x4a0] sm:$0xff]  ;;  %v4440_v24 = vpack.c.bf16 %v4410_v38, %v4410_v38 }
  0xf5   : > { %v3351_v28 = vcombine.high %v796_v22, %v800_v23  ;;  %v3350_v34 = vcombine.low %v796_v22, %v800_v23 }
  0xf7   : > { %2265 = vmatpush1.bf16.msra.mxu0 %v3286_v29  ;;  %2347 = vmatpush1.bf16.msra.mxu1 %v3288_v30  ;;  %v3353_v29 = vcombine.high %v797_v54, %v801_v25  ;;  %v804_v30 = vld [vmem:[%s4285_s8 + $0x4c0] sm:$0xff] }
  0xf8   : > { %2266 = vmatprep.subr.bf16.mxu0 %v3295_v31  ;;  %2348 = vmatprep.subr.bf16.mxu1 %v3297_v32  ;;  %v808_v31 = vld [vmem:[%s4285_s8 + $0x4e0] sm:$0xff]  ;;  %v805_v32 = vld [vmem:[%s4285_s8 + $0x4c8] sm:$0xff] }
  0xf9   : > { %v3359_v36 = vcombine.high %v804_v30, %v808_v31  ;;  %v3361_v38 = vcombine.high %v805_v32, %v809_v33  ;;  %v3358_v43 = vcombine.low %v804_v30, %v808_v31  ;;  %v3360_v44 = vcombine.low %v805_v32, %v809_v33 }
  0xfb   : > { %2267 = vmatpush1.bf16.msra.mxu0 %v3294_v39  ;;  %2349 = vmatpush1.bf16.msra.mxu1 %v3296_v40  ;;  %v812_v39 = vld [vmem:[%s4285_s8 + $0x500] sm:$0xff] }
  0xfc   : > { %2268 = vmatprep.subr.bf16.mxu0 %v3303_v41  ;;  %2350 = vmatprep.subr.bf16.mxu1 %v3305_v42  ;;  %v816_v40 = vld [vmem:[%s4285_s8 + $0x520] sm:$0xff]  ;;  %v813_v41 = vld [vmem:[%s4285_s8 + $0x508] sm:$0xff] }
  0xfd   : > { %v817_v42 = vld [vmem:[%s4285_s8 + $0x528] sm:$0xff]  ;;  %v3367_v45 = vcombine.high %v812_v39, %v816_v40  ;;  %v3366_v51 = vcombine.low %v812_v39, %v816_v40 }
  0xfe   : > { %v3369_v46 = vcombine.high %v813_v41, %v817_v42  ;;  %v3368_v52 = vcombine.low %v813_v41, %v817_v42 }
  0xff   : > { %2269 = vmatpush1.bf16.msra.mxu0 %v3302_v47  ;;  %2351 = vmatpush1.bf16.msra.mxu1 %v3304_v48  ;;  %v820_v47 = vld [vmem:[%s4285_s8 + $0x540] sm:$0xff] }
 0x100   : > { %2270 = vmatprep.subr.bf16.mxu0 %v3311_v49  ;;  %2352 = vmatprep.subr.bf16.mxu1 %v3313_v50  ;;  %v824_v48 = vld [vmem:[%s4285_s8 + $0x560] sm:$0xff]  ;;  %v821_v49 = vld [vmem:[%s4285_s8 + $0x548] sm:$0xff] }
 0x101   : > { %v825_v50 = vld [vmem:[%s4285_s8 + $0x568] sm:$0xff]  ;;  %v3375_v53 = vcombine.high %v820_v47, %v824_v48  ;;  %v3374_v61 = vcombine.low %v820_v47, %v824_v48 }
 0x102   : > { %v3377_v55 = vcombine.high %v821_v49, %v825_v50  ;;  %v3376_v62 = vcombine.low %v821_v49, %v825_v50 }
 0x103   : > { %2271 = vmatpush1.bf16.msra.mxu0 %v3310_v56  ;;  %2353 = vmatpush1.bf16.msra.mxu1 %v3312_v57  ;;  %v828_v56 = vld [vmem:[%s4285_s8 + $0x580] sm:$0xff] }
 0x104   : > { %2272 = vmatprep.subr.bf16.mxu0 %v3319_v59  ;;  %2354 = vmatprep.subr.bf16.mxu1 %v3321_v60  ;;  %v832_v57 = vld [vmem:[%s4285_s8 + $0x5a0] sm:$0xff]  ;;  %v829_v59 = vld [vmem:[%s4285_s8 + $0x588] sm:$0xff] }
 0x105   : > { %v833_v60 = vld [vmem:[%s4285_s8 + $0x5a8] sm:$0xff]  ;;  %v3383_v63 = vcombine.high %v828_v56, %v832_v57  ;;  %v3382_v5 = vcombine.low %v828_v56, %v832_v57 }
 0x106   : > { %v3385_v0 = vcombine.high %v829_v59, %v833_v60  ;;  %v3384_v6 = vcombine.low %v829_v59, %v833_v60 }
 0x107   : > { %2273 = vmatpush1.bf16.msra.mxu0 %v3318_v1  ;;  %2355 = vmatpush1.bf16.msra.mxu1 %v3320_v2  ;;  %v836_v1 = vld [vmem:[%s4285_s8 + $0x5c0] sm:$0xff] }
 0x108   : > { %2274 = vmatprep.subr.bf16.mxu0 %v3327_v3  ;;  %2356 = vmatprep.subr.bf16.mxu1 %v3329_v4  ;;  %v840_v2 = vld [vmem:[%s4285_s8 + $0x5e0] sm:$0xff]  ;;  %v837_v3 = vld [vmem:[%s4285_s8 + $0x5c8] sm:$0xff] }
 0x109   : > { %v841_v4 = vld [vmem:[%s4285_s8 + $0x5e8] sm:$0xff]  ;;  %v3391_v7 = vcombine.high %v836_v1, %v840_v2  ;;  %v3390_v13 = vcombine.low %v836_v1, %v840_v2 }
 0x10a   : > { %v3393_v8 = vcombine.high %v837_v3, %v841_v4  ;;  %v3392_v14 = vcombine.low %v837_v3, %v841_v4 }
 0x10b   : > { %2275 = vmatpush1.bf16.msra.mxu0 %v3326_v9  ;;  %2357 = vmatpush1.bf16.msra.mxu1 %v3328_v10  ;;  %v844_v9 = vld [vmem:[%s4285_s8 + $0x600] sm:$0xff] }
 0x10c   : > { %2285 = vmatprep.subr.bf16.mxu0 %v3335_v11  ;;  %2367 = vmatprep.subr.bf16.mxu1 %v3337_v12  ;;  %v848_v10 = vld [vmem:[%s4285_s8 + $0x620] sm:$0xff]  ;;  %v845_v11 = vld [vmem:[%s4285_s8 + $0x608] sm:$0xff] }
 0x10d   : > { %v849_v12 = vld [vmem:[%s4285_s8 + $0x628] sm:$0xff]  ;;  %v3399_v16 = vcombine.high %v844_v9, %v848_v10  ;;  %v3398_v22 = vcombine.low %v844_v9, %v848_v10 }
 0x10e   : > { %2277 = vmatmul.mubr.bf16.vlgmr.msra.gmra.mrb[0].mxu0 %v4432_v15  ;;  %2359 = vmatmul.mubr.bf16.vlgmr.msra.gmra.mrb[0].mxu1 %v4432_v15  ;;  %v3401_v17 = vcombine.high %v845_v11, %v849_v12  ;;  %v3400_v23 = vcombine.low %v845_v11, %v849_v12 }
 0x10f   : > { %2286 = vmatpush1.bf16.msra.mxu0 %v3334_v18  ;;  %2368 = vmatpush1.bf16.msra.mxu1 %v3336_v19  ;;  %v852_v18 = vld [vmem:[%s4285_s8 + $0x640] sm:$0xff] }
 0x110   : > { %2287 = vmatprep.subr.bf16.mxu0 %v3343_v20  ;;  %2369 = vmatprep.subr.bf16.mxu1 %v3345_v21  ;;  %v856_v19 = vld [vmem:[%s4285_s8 + $0x660] sm:$0xff]  ;;  %v853_v20 = vld [vmem:[%s4285_s8 + $0x648] sm:$0xff] }
 0x111   : > { %2317 = vmatprep.mubr.bf16.mxu0 %v4440_v24  ;;  %2399 = vmatprep.mubr.bf16.mxu1 %v4440_v24  ;;  %v857_v21 = vld [vmem:[%s4285_s8 + $0x668] sm:$0xff]  ;;  %v3407_v54 = vcombine.high %v852_v18, %v856_v19  ;;  %v3406_v30 = vcombine.low %v852_v18, %v856_v19 }
 0x112   : > { %v3409_v25 = vcombine.high %v853_v20, %v857_v21  ;;  %v3408_v31 = vcombine.low %v853_v20, %v857_v21 }
 0x113   : > { %2288 = vmatpush1.bf16.msra.mxu0 %v3342_v26  ;;  %2370 = vmatpush1.bf16.msra.mxu1 %v3344_v27  ;;  %v860_v26 = vld [vmem:[%s4285_s8 + $0x680] sm:$0xff] }
 0x114   : > { %2289 = vmatprep.subr.bf16.mxu0 %v3351_v28  ;;  %2371 = vmatprep.subr.bf16.mxu1 %v3353_v29  ;;  %v864_v27 = vld [vmem:[%s4285_s8 + $0x6a0] sm:$0xff]  ;;  %v861_v28 = vld [vmem:[%s4285_s8 + $0x688] sm:$0xff] }
 0x115   : > { %v865_v29 = vld [vmem:[%s4285_s8 + $0x6a8] sm:$0xff]  ;;  %v3415_v32 = vcombine.high %v860_v26, %v864_v27  ;;  %v3414_v39 = vcombine.low %v860_v26, %v864_v27  ;;  %v667_v26 = vld [vmem:[%s4285_s8 + $0x78] sm:$0xff] }
 0x116   : > { %v3417_v33 = vcombine.high %v861_v28, %v865_v29  ;;  %v3416_v40 = vcombine.low %v861_v28, %v865_v29 }
 0x117   : > { %2290 = vmatpush1.bf16.msra.mxu0 %v3350_v34  ;;  %2372 = vmatpush1.bf16.msra.mxu1 %v3352_v35  ;;  %v868_v34 = vld [vmem:[%s4285_s8 + $0x6c0] sm:$0xff] }
 0x118   : > { %2291 = vmatprep.subr.bf16.mxu0 %v3359_v36  ;;  %2373 = vmatprep.subr.bf16.mxu1 %v3361_v38  ;;  %v872_v35 = vld [vmem:[%s4285_s8 + $0x6e0] sm:$0xff]  ;;  %v869_v36 = vld [vmem:[%s4285_s8 + $0x6c8] sm:$0xff] }
 0x119   : > { %v873_v38 = vld [vmem:[%s4285_s8 + $0x6e8] sm:$0xff]  ;;  %v3423_v41 = vcombine.high %v868_v34, %v872_v35  ;;  %v3422_v47 = vcombine.low %v868_v34, %v872_v35 }
 0x11a   : > { %v3425_v42 = vcombine.high %v869_v36, %v873_v38  ;;  %v3424_v48 = vcombine.low %v869_v36, %v873_v38 }
 0x11b   : > { %2292 = vmatpush1.bf16.msra.mxu0 %v3358_v43  ;;  %2374 = vmatpush1.bf16.msra.mxu1 %v3360_v44  ;;  %v876_v43 = vld [vmem:[%s4285_s8 + $0x700] sm:$0xff] }
 0x11c   : > { %2293 = vmatprep.subr.bf16.mxu0 %v3367_v45  ;;  %2375 = vmatprep.subr.bf16.mxu1 %v3369_v46  ;;  %v880_v44 = vld [vmem:[%s4285_s8 + $0x720] sm:$0xff]  ;;  %v877_v45 = vld [vmem:[%s4285_s8 + $0x708] sm:$0xff] }
 0x11d   : > { %v881_v46 = vld [vmem:[%s4285_s8 + $0x728] sm:$0xff]  ;;  %v3431_v49 = vcombine.high %v876_v43, %v880_v44  ;;  %v3430_v56 = vcombine.low %v876_v43, %v880_v44 }
 0x11e   : > { %v3433_v50 = vcombine.high %v877_v45, %v881_v46  ;;  %v3432_v57 = vcombine.low %v877_v45, %v881_v46 }
 0x11f   : > { %2294 = vmatpush1.bf16.msra.mxu0 %v3366_v51  ;;  %2376 = vmatpush1.bf16.msra.mxu1 %v3368_v52  ;;  %v884_v51 = vld [vmem:[%s4285_s8 + $0x740] sm:$0xff] }
 0x120   : > { %2295 = vmatprep.subr.bf16.mxu0 %v3375_v53  ;;  %2377 = vmatprep.subr.bf16.mxu1 %v3377_v55  ;;  %v888_v52 = vld [vmem:[%s4285_s8 + $0x760] sm:$0xff]  ;;  %v885_v53 = vld [vmem:[%s4285_s8 + $0x748] sm:$0xff] }
 0x121   : > { %v889_v55 = vld [vmem:[%s4285_s8 + $0x768] sm:$0xff]  ;;  %v3439_v59 = vcombine.high %v884_v51, %v888_v52  ;;  %v3438_v1 = vcombine.low %v884_v51, %v888_v52 }
 0x122   : > { %v3441_v60 = vcombine.high %v885_v53, %v889_v55  ;;  %v3440_v2 = vcombine.low %v885_v53, %v889_v55  ;;  %v694_v55 = vld [vmem:[%s4285_s8 + $0x150] sm:$0xff] }
 0x123   : > { %2296 = vmatpush1.bf16.msra.mxu0 %v3374_v61  ;;  %2378 = vmatpush1.bf16.msra.mxu1 %v3376_v62  ;;  %v892_v61 = vld [vmem:[%s4285_s8 + $0x780] sm:$0xff] }
 0x124   : > { %2297 = vmatprep.subr.bf16.mxu0 %v3383_v63  ;;  %2379 = vmatprep.subr.bf16.mxu1 %v3385_v0  ;;  %v896_v62 = vld [vmem:[%s4285_s8 + $0x7a0] sm:$0xff]  ;;  %v893_v63 = vld [vmem:[%s4285_s8 + $0x788] sm:$0xff] }
 0x125   : > { %v897_v0 = vld [vmem:[%s4285_s8 + $0x7a8] sm:$0xff]  ;;  %v3447_v3 = vcombine.high %v892_v61, %v896_v62  ;;  %v3446_v9 = vcombine.low %v892_v61, %v896_v62 }
 0x126   : > { %v3449_v4 = vcombine.high %v893_v63, %v897_v0  ;;  %v3448_v10 = vcombine.low %v893_v63, %v897_v0  ;;  %v702_v0 = vld [vmem:[%s4285_s8 + $0x190] sm:$0xff] }
 0x127   : > { %2298 = vmatpush1.bf16.msra.mxu0 %v3382_v5  ;;  %2380 = vmatpush1.bf16.msra.mxu1 %v3384_v6  ;;  %v900_v5 = vld [vmem:[%s4285_s8 + $0x7c0] sm:$0xff] }
 0x128   : > { %2299 = vmatprep.subr.bf16.mxu0 %v3391_v7  ;;  %2381 = vmatprep.subr.bf16.mxu1 %v3393_v8  ;;  %v904_v6 = vld [vmem:[%s4285_s8 + $0x7e0] sm:$0xff]  ;;  %v901_v7 = vld [vmem:[%s4285_s8 + $0x7c8] sm:$0xff] }
 0x129   : > { %v905_v8 = vld [vmem:[%s4285_s8 + $0x7e8] sm:$0xff]  ;;  %v3455_v11 = vcombine.high %v900_v5, %v904_v6  ;;  %v3454_v18 = vcombine.low %v900_v5, %v904_v6 }
 0x12a   : > { %v3457_v12 = vcombine.high %v901_v7, %v905_v8  ;;  %v3456_v19 = vcombine.low %v901_v7, %v905_v8  ;;  %v710_v8 = vld [vmem:[%s4285_s8 + $0x1d0] sm:$0xff] }
 0x12b   : > { %2300 = vmatpush1.bf16.msra.mxu0 %v3390_v13  ;;  %2382 = vmatpush1.bf16.msra.mxu1 %v3392_v14  ;;  %v654_v13 = vld [vmem:[%s4285_s8 + $0x10] sm:$0xff] }
 0x12c   : > { %2301 = vmatprep.subr.bf16.mxu0 %v3399_v16  ;;  %2383 = vmatprep.subr.bf16.mxu1 %v3401_v17  ;;  %v658_v14 = vld [vmem:[%s4285_s8 + $0x30] sm:$0xff]  ;;  %v655_v16 = vld [vmem:[%s4285_s8 + $0x18] sm:$0xff] }
 0x12d   : > { %v659_v17 = vld [vmem:[%s4285_s8 + $0x38] sm:$0xff]  ;;  %v3211_v20 = vcombine.high %v654_v13, %v658_v14  ;;  %v3210_v27 = vcombine.low %v654_v13, %v658_v14 }
 0x12e   : > { %v3213_v21 = vcombine.high %v655_v16, %v659_v17  ;;  %v3212_v28 = vcombine.low %v655_v16, %v659_v17  ;;  %v718_v17 = vld [vmem:[%s4285_s8 + $0x210] sm:$0xff] }
 0x12f   : > { %2302 = vmatpush1.bf16.msra.mxu0 %v3398_v22  ;;  %2384 = vmatpush1.bf16.msra.mxu1 %v3400_v23  ;;  %v662_v22 = vld [vmem:[%s4285_s8 + $0x50] sm:$0xff] }
 0x130   : > { %2303 = vmatprep.subr.bf16.mxu0 %v3407_v54  ;;  %2385 = vmatprep.subr.bf16.mxu1 %v3409_v25  ;;  %v666_v23 = vld [vmem:[%s4285_s8 + $0x70] sm:$0xff]  ;;  %v4508_v54 = vpack.c.bf16 %v4407_v37, %v4407_v37  ;;  %v663_v25 = vld [vmem:[%s4285_s8 + $0x58] sm:$0xff] }
 0x131   : > { %v3219_v29 = vcombine.high %v662_v22, %v666_v23  ;;  %v671_v37 = vld [vmem:[%s4285_s8 + $0x98] sm:$0xff]  ;;  %v3218_v34 = vcombine.low %v662_v22, %v666_v23  ;;  %v3220_v35 = vcombine.low %v663_v25, %v667_v26 }
 0x133   : > { %2304 = vmatpush1.bf16.msra.mxu0 %v3406_v30  ;;  %2386 = vmatpush1.bf16.msra.mxu1 %v3408_v31  ;;  %v3221_v30 = vcombine.high %v663_v25, %v667_v26  ;;  %v670_v31 = vld [vmem:[%s4285_s8 + $0x90] sm:$0xff] }
 0x134   : > { %2305 = vmatprep.subr.bf16.mxu0 %v3415_v32  ;;  %2387 = vmatprep.subr.bf16.mxu1 %v3417_v33  ;;  %v674_v32 = vld [vmem:[%s4285_s8 + $0xb0] sm:$0xff]  ;;  %v675_v33 = vld [vmem:[%s4285_s8 + $0xb8] sm:$0xff] }
 0x135   : > { %v3227_v36 = vcombine.high %v670_v31, %v674_v32  ;;  %v3229_v38 = vcombine.high %v671_v37, %v675_v33  ;;  %v3226_v43 = vcombine.low %v670_v31, %v674_v32  ;;  %v3228_v44 = vcombine.low %v671_v37, %v675_v33  ;;  %v726_v26 = vld [vmem:[%s4285_s8 + $0x250] sm:$0xff] }
 0x136   : > { %v734_v33 = vld [vmem:[%s4285_s8 + $0x290] sm:$0xff] }
 0x137   : > { %2306 = vmatpush1.bf16.msra.mxu0 %v3414_v39  ;;  %2388 = vmatpush1.bf16.msra.mxu1 %v3416_v40  ;;  %v678_v39 = vld [vmem:[%s4285_s8 + $0xd0] sm:$0xff] }
 0x138   : > { %2307 = vmatprep.subr.bf16.mxu0 %v3423_v41  ;;  %2389 = vmatprep.subr.bf16.mxu1 %v3425_v42  ;;  %v682_v40 = vld [vmem:[%s4285_s8 + $0xf0] sm:$0xff]  ;;  %v679_v41 = vld [vmem:[%s4285_s8 + $0xd8] sm:$0xff] }
 0x139   : > { %v683_v42 = vld [vmem:[%s4285_s8 + $0xf8] sm:$0xff]  ;;  %v3235_v45 = vcombine.high %v678_v39, %v682_v40  ;;  %v3234_v51 = vcombine.low %v678_v39, %v682_v40 }
 0x13a   : > { %v3237_v46 = vcombine.high %v679_v41, %v683_v42 }
 0x13b   : > { %2308 = vmatpush1.bf16.msra.mxu0 %v3422_v47  ;;  %2390 = vmatpush1.bf16.msra.mxu1 %v3424_v48  ;;  %v686_v47 = vld [vmem:[%s4285_s8 + $0x110] sm:$0xff] }
 0x13c   : > { %2309 = vmatprep.subr.bf16.mxu0 %v3431_v49  ;;  %2391 = vmatprep.subr.bf16.mxu1 %v3433_v50  ;;  %v690_v48 = vld [vmem:[%s4285_s8 + $0x130] sm:$0xff]  ;;  %v687_v49 = vld [vmem:[%s4285_s8 + $0x118] sm:$0xff] }
 0x13d   : > { %v691_v50 = vld [vmem:[%s4285_s8 + $0x138] sm:$0xff]  ;;  %v3243_v52 = vcombine.high %v686_v47, %v690_v48 }
 0x13e   : > { %v3245_v53 = vcombine.high %v687_v49, %v691_v50  ;;  %v3244_v61 = vcombine.low %v687_v49, %v691_v50  ;;  %v750_v50 = vld [vmem:[%s4285_s8 + $0x310] sm:$0xff] }
 0x13f   : > { %2310 = vmatpush1.bf16.msra.mxu0 %v3430_v56  ;;  %2392 = vmatpush1.bf16.msra.mxu1 %v3432_v57  ;;  %v698_v56 = vld [vmem:[%s4285_s8 + $0x170] sm:$0xff]  ;;  %v695_v57 = vld [vmem:[%s4285_s8 + $0x158] sm:$0xff] }
 0x140   : > { %2311 = vmatprep.subr.bf16.mxu0 %v3439_v59  ;;  %2393 = vmatprep.subr.bf16.mxu1 %v3441_v60  ;;  %v699_v59 = vld [vmem:[%s4285_s8 + $0x178] sm:$0xff]  ;;  %v3242_v60 = vcombine.low %v686_v47, %v690_v48  ;;  %v3251_v62 = vcombine.high %v694_v55, %v698_v56 }
 0x141   : > { %v3253_v63 = vcombine.high %v695_v57, %v699_v59  ;;  %v3252_v5 = vcombine.low %v695_v57, %v699_v59  ;;  %v758_v59 = vld [vmem:[%s4285_s8 + $0x350] sm:$0xff] }
 0x143   : > { %2312 = vmatpush1.bf16.msra.mxu0 %v3438_v1  ;;  %2394 = vmatpush1.bf16.msra.mxu1 %v3440_v2  ;;  %v706_v1 = vld [vmem:[%s4285_s8 + $0x1b0] sm:$0xff]  ;;  %v703_v2 = vld [vmem:[%s4285_s8 + $0x198] sm:$0xff] }
 0x144   : > { %2313 = vmatprep.subr.bf16.mxu0 %v3447_v3  ;;  %2395 = vmatprep.subr.bf16.mxu1 %v3449_v4  ;;  %v707_v3 = vld [vmem:[%s4285_s8 + $0x1b8] sm:$0xff]  ;;  %v3250_v4 = vcombine.low %v694_v55, %v698_v56  ;;  %v3259_v6 = vcombine.high %v702_v0, %v706_v1 }
 0x145   : > { %v3261_v7 = vcombine.high %v703_v2, %v707_v3  ;;  %v3260_v13 = vcombine.low %v703_v2, %v707_v3  ;;  %v766_v3 = vld [vmem:[%s4285_s8 + $0x390] sm:$0xff] }
 0x147   : > { %2314 = vmatpush1.bf16.msra.mxu0 %v3446_v9  ;;  %2396 = vmatpush1.bf16.msra.mxu1 %v3448_v10  ;;  %v714_v9 = vld [vmem:[%s4285_s8 + $0x1f0] sm:$0xff]  ;;  %v711_v10 = vld [vmem:[%s4285_s8 + $0x1d8] sm:$0xff] }
 0x148   : > { %2315 = vmatprep.subr.bf16.mxu0 %v3455_v11  ;;  %2397 = vmatprep.subr.bf16.mxu1 %v3457_v12  ;;  %v715_v11 = vld [vmem:[%s4285_s8 + $0x1f8] sm:$0xff]  ;;  %v3258_v12 = vcombine.low %v702_v0, %v706_v1  ;;  %v3267_v14 = vcombine.high %v710_v8, %v714_v9 }
 0x149   : > { %v3269_v16 = vcombine.high %v711_v10, %v715_v11  ;;  %v3268_v22 = vcombine.low %v711_v10, %v715_v11  ;;  %v774_v11 = vld [vmem:[%s4285_s8 + $0x3d0] sm:$0xff] }
 0x14b   : > { %2316 = vmatpush1.bf16.msra.mxu0 %v3454_v18  ;;  %2398 = vmatpush1.bf16.msra.mxu1 %v3456_v19  ;;  %v722_v18 = vld [vmem:[%s4285_s8 + $0x230] sm:$0xff]  ;;  %v719_v19 = vld [vmem:[%s4285_s8 + $0x218] sm:$0xff] }
 0x14c   : > { %2408 = vmatprep.subr.bf16.mxu0 %v3211_v20  ;;  %2490 = vmatprep.subr.bf16.mxu1 %v3213_v21  ;;  %v723_v20 = vld [vmem:[%s4285_s8 + $0x238] sm:$0xff]  ;;  %v3266_v21 = vcombine.low %v710_v8, %v714_v9  ;;  %v3275_v23 = vcombine.high %v718_v17, %v722_v18 }
 0x14d   : > { %v3277_v25 = vcombine.high %v719_v19, %v723_v20  ;;  %v3276_v31 = vcombine.low %v719_v19, %v723_v20  ;;  %v782_v20 = vld [vmem:[%s4285_s8 + $0x410] sm:$0xff] }
 0x14e   : > { %2318 = vmatmul.mubr.bf16.vlgmr.msra.gmra.mrb[0].mxu0 %v4508_v54  ;;  %2400 = vmatmul.mubr.bf16.vlgmr.msra.gmra.mrb[0].mxu1 %v4508_v54 }
 0x14f   : > { %2409 = vmatpush1.bf16.msra.mxu0 %v3210_v27  ;;  %2491 = vmatpush1.bf16.msra.mxu1 %v3212_v28  ;;  %v730_v27 = vld [vmem:[%s4285_s8 + $0x270] sm:$0xff]  ;;  %v727_v28 = vld [vmem:[%s4285_s8 + $0x258] sm:$0xff] }
 0x150   : > { %2410 = vmatprep.subr.bf16.mxu0 %v3219_v29  ;;  %2492 = vmatprep.subr.bf16.mxu1 %v3221_v30  ;;  %v731_v29 = vld [vmem:[%s4285_s8 + $0x278] sm:$0xff]  ;;  %v3274_v30 = vcombine.low %v718_v17, %v722_v18  ;;  %v3283_v32 = vcombine.high %v726_v26, %v730_v27 }
 0x151   : > { %2440 = vmatprep.mubr.bf16.mxu0 %v4380_v58  ;;  %2522 = vmatprep.mubr.bf16.mxu1 %v4380_v58  ;;  %v3236_v58 = vcombine.low %v679_v41, %v683_v42  ;;  %v3285_v37 = vcombine.high %v727_v28, %v731_v29  ;;  %v3284_v39 = vcombine.low %v727_v28, %v731_v29  ;;  %v742_v42 = vld [vmem:[%s4285_s8 + $0x2d0] sm:$0xff] }
 0x152   : > { %v790_v29 = vld [vmem:[%s4285_s8 + $0x450] sm:$0xff] }
 0x153   : > { %2411 = vmatpush1.bf16.msra.mxu0 %v3218_v34  ;;  %2493 = vmatpush1.bf16.msra.mxu1 %v3220_v35  ;;  %v738_v34 = vld [vmem:[%s4285_s8 + $0x2b0] sm:$0xff]  ;;  %v735_v35 = vld [vmem:[%s4285_s8 + $0x298] sm:$0xff] }
 0x154   : > { %2412 = vmatprep.subr.bf16.mxu0 %v3227_v36  ;;  %2494 = vmatprep.subr.bf16.mxu1 %v3229_v38  ;;  %v739_v36 = vld [vmem:[%s4285_s8 + $0x2b8] sm:$0xff]  ;;  %v3282_v38 = vcombine.low %v726_v26, %v730_v27  ;;  %v3291_v40 = vcombine.high %v734_v33, %v738_v34 }
 0x155   : > { %v3293_v41 = vcombine.high %v735_v35, %v739_v36  ;;  %v3292_v47 = vcombine.low %v735_v35, %v739_v36  ;;  %v798_v36 = vld [vmem:[%s4285_s8 + $0x490] sm:$0xff] }
 0x157   : > { %2413 = vmatpush1.bf16.msra.mxu0 %v3226_v43  ;;  %2495 = vmatpush1.bf16.msra.mxu1 %v3228_v44  ;;  %v746_v43 = vld [vmem:[%s4285_s8 + $0x2f0] sm:$0xff]  ;;  %v743_v44 = vld [vmem:[%s4285_s8 + $0x2d8] sm:$0xff] }
 0x158   : > { %2414 = vmatprep.subr.bf16.mxu0 %v3235_v45  ;;  %2496 = vmatprep.subr.bf16.mxu1 %v3237_v46  ;;  %v747_v45 = vld [vmem:[%s4285_s8 + $0x2f8] sm:$0xff]  ;;  %v3290_v46 = vcombine.low %v734_v33, %v738_v34  ;;  %v3299_v48 = vcombine.high %v742_v42, %v746_v43 }
 0x159   : > { %v3301_v49 = vcombine.high %v743_v44, %v747_v45  ;;  %v3300_v55 = vcombine.low %v743_v44, %v747_v45  ;;  %v806_v45 = vld [vmem:[%s4285_s8 + $0x4d0] sm:$0xff] }
 0x15b   : > { %2415 = vmatpush1.bf16.msra.mxu0 %v3234_v51  ;;  %2497 = vmatpush1.bf16.msra.mxu1 %v3236_v58  ;;  %v754_v51 = vld [vmem:[%s4285_s8 + $0x330] sm:$0xff]  ;;  %v751_v58 = vld [vmem:[%s4285_s8 + $0x318] sm:$0xff] }
 0x15c   : > { %2416 = vmatprep.subr.bf16.mxu0 %v3243_v52  ;;  %2498 = vmatprep.subr.bf16.mxu1 %v3245_v53  ;;  %v755_v52 = vld [vmem:[%s4285_s8 + $0x338] sm:$0xff]  ;;  %v3298_v53 = vcombine.low %v742_v42, %v746_v43  ;;  %v3307_v56 = vcombine.high %v750_v50, %v754_v51 }
 0x15d   : > { %v3309_v57 = vcombine.high %v751_v58, %v755_v52  ;;  %v3308_v0 = vcombine.low %v751_v58, %v755_v52  ;;  %v814_v58 = vld [vmem:[%s4285_s8 + $0x510] sm:$0xff] }
 0x15e   : > { %v818_v52 = vld [vmem:[%s4285_s8 + $0x530] sm:$0xff] }
 0x15f   : > { %2417 = vmatpush1.bf16.msra.mxu0 %v3242_v60  ;;  %2499 = vmatpush1.bf16.msra.mxu1 %v3244_v61  ;;  %v762_v60 = vld [vmem:[%s4285_s8 + $0x370] sm:$0xff]  ;;  %v759_v61 = vld [vmem:[%s4285_s8 + $0x358] sm:$0xff] }
 0x160   : > { %2418 = vmatprep.subr.bf16.mxu0 %v3251_v62  ;;  %2500 = vmatprep.subr.bf16.mxu1 %v3253_v63  ;;  %v763_v62 = vld [vmem:[%s4285_s8 + $0x378] sm:$0xff]  ;;  %v3306_v63 = vcombine.low %v750_v50, %v754_v51  ;;  %v3315_v1 = vcombine.high %v758_v59, %v762_v60 }
 0x161   : > { %v3317_v2 = vcombine.high %v759_v61, %v763_v62  ;;  %v3316_v8 = vcombine.low %v759_v61, %v763_v62  ;;  %v826_v61 = vld [vmem:[%s4285_s8 + $0x570] sm:$0xff]  ;;  %v823_v62 = vld [vmem:[%s4285_s8 + $0x558] sm:$0xff] }
 0x163   : > { %2419 = vmatpush1.bf16.msra.mxu0 %v3250_v4  ;;  %2501 = vmatpush1.bf16.msra.mxu1 %v3252_v5  ;;  %v770_v4 = vld [vmem:[%s4285_s8 + $0x3b0] sm:$0xff]  ;;  %v767_v5 = vld [vmem:[%s4285_s8 + $0x398] sm:$0xff] }
 0x164   : > { %2420 = vmatprep.subr.bf16.mxu0 %v3259_v6  ;;  %2502 = vmatprep.subr.bf16.mxu1 %v3261_v7  ;;  %v771_v6 = vld [vmem:[%s4285_s8 + $0x3b8] sm:$0xff]  ;;  %v3314_v7 = vcombine.low %v758_v59, %v762_v60  ;;  %v3323_v9 = vcombine.high %v766_v3, %v770_v4  ;;  %v822_v60 = vld [vmem:[%s4285_s8 + $0x550] sm:$0xff] }
 0x165   : > { %v3325_v10 = vcombine.high %v767_v5, %v771_v6  ;;  %v3324_v17 = vcombine.low %v767_v5, %v771_v6  ;;  %v834_v5 = vld [vmem:[%s4285_s8 + $0x5b0] sm:$0xff]  ;;  %v831_v6 = vld [vmem:[%s4285_s8 + $0x598] sm:$0xff] }
 0x167   : > { %2421 = vmatpush1.bf16.msra.mxu0 %v3258_v12  ;;  %2503 = vmatpush1.bf16.msra.mxu1 %v3260_v13  ;;  %v778_v12 = vld [vmem:[%s4285_s8 + $0x3f0] sm:$0xff]  ;;  %v775_v13 = vld [vmem:[%s4285_s8 + $0x3d8] sm:$0xff] }
 0x168   : > { %2422 = vmatprep.subr.bf16.mxu0 %v3267_v14  ;;  %2504 = vmatprep.subr.bf16.mxu1 %v3269_v16  ;;  %v779_v14 = vld [vmem:[%s4285_s8 + $0x3f8] sm:$0xff]  ;;  %v3322_v16 = vcombine.low %v766_v3, %v770_v4  ;;  %v3331_v18 = vcombine.high %v774_v11, %v778_v12  ;;  %v830_v4 = vld [vmem:[%s4285_s8 + $0x590] sm:$0xff] }
 0x169   : > { %v3333_v19 = vcombine.high %v775_v13, %v779_v14  ;;  %v3332_v26 = vcombine.low %v775_v13, %v779_v14  ;;  %v842_v13 = vld [vmem:[%s4285_s8 + $0x5f0] sm:$0xff]  ;;  %v839_v14 = vld [vmem:[%s4285_s8 + $0x5d8] sm:$0xff] }
 0x16b   : > { %2423 = vmatpush1.bf16.msra.mxu0 %v3266_v21  ;;  %2505 = vmatpush1.bf16.msra.mxu1 %v3268_v22  ;;  %v786_v21 = vld [vmem:[%s4285_s8 + $0x430] sm:$0xff]  ;;  %v783_v22 = vld [vmem:[%s4285_s8 + $0x418] sm:$0xff] }
 0x16c   : > { %2424 = vmatprep.subr.bf16.mxu0 %v3275_v23  ;;  %2506 = vmatprep.subr.bf16.mxu1 %v3277_v25  ;;  %v787_v23 = vld [vmem:[%s4285_s8 + $0x438] sm:$0xff]  ;;  %v3330_v25 = vcombine.low %v774_v11, %v778_v12  ;;  %v3339_v27 = vcombine.high %v782_v20, %v786_v21  ;;  %v838_v12 = vld [vmem:[%s4285_s8 + $0x5d0] sm:$0xff] }
 0x16d   : > { %v3341_v28 = vcombine.high %v783_v22, %v787_v23  ;;  %v3340_v33 = vcombine.low %v783_v22, %v787_v23  ;;  %v850_v22 = vld [vmem:[%s4285_s8 + $0x630] sm:$0xff]  ;;  %v847_v23 = vld [vmem:[%s4285_s8 + $0x618] sm:$0xff] }
 0x16f   : > { %2425 = vmatpush1.bf16.msra.mxu0 %v3274_v30  ;;  %2507 = vmatpush1.bf16.msra.mxu1 %v3276_v31  ;;  %v794_v30 = vld [vmem:[%s4285_s8 + $0x470] sm:$0xff]  ;;  %v791_v31 = vld [vmem:[%s4285_s8 + $0x458] sm:$0xff] }
 0x170   : > { %2426 = vmatprep.subr.bf16.mxu0 %v3283_v32  ;;  %2508 = vmatprep.subr.bf16.mxu1 %v3285_v37  ;;  %v795_v32 = vld [vmem:[%s4285_s8 + $0x478] sm:$0xff]  ;;  %v3338_v37 = vcombine.low %v782_v20, %v786_v21  ;;  %v3347_v34 = vcombine.high %v790_v29, %v794_v30  ;;  %v846_v21 = vld [vmem:[%s4285_s8 + $0x610] sm:$0xff] }
 0x171   : > { %v3349_v35 = vcombine.high %v791_v31, %v795_v32  ;;  %v3348_v42 = vcombine.low %v791_v31, %v795_v32  ;;  %v858_v31 = vld [vmem:[%s4285_s8 + $0x670] sm:$0xff]  ;;  %v855_v32 = vld [vmem:[%s4285_s8 + $0x658] sm:$0xff] }
 0x173   : > { %2427 = vmatpush1.bf16.msra.mxu0 %v3282_v38  ;;  %2509 = vmatpush1.bf16.msra.mxu1 %v3284_v39  ;;  %v802_v38 = vld [vmem:[%s4285_s8 + $0x4b0] sm:$0xff]  ;;  %v799_v39 = vld [vmem:[%s4285_s8 + $0x498] sm:$0xff] }
 0x174   : > { %2428 = vmatprep.subr.bf16.mxu0 %v3291_v40  ;;  %2510 = vmatprep.subr.bf16.mxu1 %v3293_v41  ;;  %v803_v40 = vld [vmem:[%s4285_s8 + $0x4b8] sm:$0xff]  ;;  %v3346_v41 = vcombine.low %v790_v29, %v794_v30  ;;  %v3355_v43 = vcombine.high %v798_v36, %v802_v38  ;;  %v854_v30 = vld [vmem:[%s4285_s8 + $0x650] sm:$0xff] }
 0x175   : > { %v3357_v44 = vcombine.high %v799_v39, %v803_v40 }
 0x177   : > { %2429 = vmatpush1.bf16.msra.mxu0 %v3290_v46  ;;  %2511 = vmatpush1.bf16.msra.mxu1 %v3292_v47  ;;  %v810_v46 = vld [vmem:[%s4285_s8 + $0x4f0] sm:$0xff]  ;;  %v807_v47 = vld [vmem:[%s4285_s8 + $0x4d8] sm:$0xff] }
 0x178   : > { %2430 = vmatprep.subr.bf16.mxu0 %v3299_v48  ;;  %2512 = vmatprep.subr.bf16.mxu1 %v3301_v49  ;;  %v811_v48 = vld [vmem:[%s4285_s8 + $0x4f8] sm:$0xff]  ;;  %v3356_v49 = vcombine.low %v799_v39, %v803_v40  ;;  %v3363_v50 = vcombine.high %v806_v45, %v810_v46  ;;  %v866_v39 = vld [vmem:[%s4285_s8 + $0x6b0] sm:$0xff] }
 0x179   : > { %v3365_v51 = vcombine.high %v807_v47, %v811_v48  ;;  %v863_v40 = vld [vmem:[%s4285_s8 + $0x698] sm:$0xff] }
 0x17b   : > { %2431 = vmatpush1.bf16.msra.mxu0 %v3298_v53  ;;  %2513 = vmatpush1.bf16.msra.mxu1 %v3300_v55  ;;  %v815_v53 = vld [vmem:[%s4285_s8 + $0x518] sm:$0xff] }
 0x17c   : > { %2432 = vmatprep.subr.bf16.mxu0 %v3307_v56  ;;  %2514 = vmatprep.subr.bf16.mxu1 %v3309_v57  ;;  %v819_v55 = vld [vmem:[%s4285_s8 + $0x538] sm:$0xff]  ;;  %v3362_v56 = vcombine.low %v806_v45, %v810_v46  ;;  %v3371_v57 = vcombine.high %v814_v58, %v818_v52  ;;  %v870_v46 = vld [vmem:[%s4285_s8 + $0x6d0] sm:$0xff] }
 0x17d   : > { %v3373_v59 = vcombine.high %v815_v53, %v819_v55 }
 0x17f   : > { %2433 = vmatpush1.bf16.msra.mxu0 %v3306_v63  ;;  %2515 = vmatpush1.bf16.msra.mxu1 %v3308_v0  ;;  %v827_v63 = vld [vmem:[%s4285_s8 + $0x578] sm:$0xff]  ;;  %v3370_v0 = vcombine.low %v814_v58, %v818_v52  ;;  %v878_v52 = vld [vmem:[%s4285_s8 + $0x710] sm:$0xff] }
 0x180   : > { %2434 = vmatprep.subr.bf16.mxu0 %v3315_v1  ;;  %2516 = vmatprep.subr.bf16.mxu1 %v3317_v2  ;;  %v3372_v1 = vcombine.low %v815_v53, %v819_v55  ;;  %v3379_v2 = vcombine.high %v822_v60, %v826_v61  ;;  %v3381_v3 = vcombine.high %v823_v62, %v827_v63  ;;  %v882_v53 = vld [vmem:[%s4285_s8 + $0x730] sm:$0xff]  ;;  %v879_v55 = vld [vmem:[%s4285_s8 + $0x718] sm:$0xff] }
 0x183   : > { %2435 = vmatpush1.bf16.msra.mxu0 %v3314_v7  ;;  %2517 = vmatpush1.bf16.msra.mxu1 %v3316_v8  ;;  %v835_v7 = vld [vmem:[%s4285_s8 + $0x5b8] sm:$0xff]  ;;  %v3378_v8 = vcombine.low %v822_v60, %v826_v61  ;;  %v886_v61 = vld [vmem:[%s4285_s8 + $0x750] sm:$0xff] }
 0x184   : > { %2436 = vmatprep.subr.bf16.mxu0 %v3323_v9  ;;  %2518 = vmatprep.subr.bf16.mxu1 %v3325_v10  ;;  %v3380_v9 = vcombine.low %v823_v62, %v827_v63  ;;  %v3387_v10 = vcombine.high %v830_v4, %v834_v5  ;;  %v3389_v11 = vcombine.high %v831_v6, %v835_v7  ;;  %v890_v62 = vld [vmem:[%s4285_s8 + $0x770] sm:$0xff]  ;;  %v887_v63 = vld [vmem:[%s4285_s8 + $0x758] sm:$0xff] }
 0x187   : > { %2437 = vmatpush1.bf16.msra.mxu0 %v3322_v16  ;;  %2519 = vmatpush1.bf16.msra.mxu1 %v3324_v17  ;;  %v843_v16 = vld [vmem:[%s4285_s8 + $0x5f8] sm:$0xff]  ;;  %v3386_v17 = vcombine.low %v830_v4, %v834_v5  ;;  %v894_v5 = vld [vmem:[%s4285_s8 + $0x790] sm:$0xff] }
 0x188   : > { %2438 = vmatprep.subr.bf16.mxu0 %v3331_v18  ;;  %2520 = vmatprep.subr.bf16.mxu1 %v3333_v19  ;;  %v3388_v18 = vcombine.low %v831_v6, %v835_v7  ;;  %v3395_v19 = vcombine.high %v838_v12, %v842_v13  ;;  %v3397_v20 = vcombine.high %v839_v14, %v843_v16  ;;  %v898_v6 = vld [vmem:[%s4285_s8 + $0x7b0] sm:$0xff]  ;;  %v895_v7 = vld [vmem:[%s4285_s8 + $0x798] sm:$0xff] }
 0x18b   : > { %2439 = vmatpush1.bf16.msra.mxu0 %v3330_v25  ;;  %2521 = vmatpush1.bf16.msra.mxu1 %v3332_v26  ;;  %v851_v25 = vld [vmem:[%s4285_s8 + $0x638] sm:$0xff]  ;;  %v3394_v26 = vcombine.low %v838_v12, %v842_v13  ;;  %v902_v13 = vld [vmem:[%s4285_s8 + $0x7d0] sm:$0xff] }
 0x18c   : > { %2449 = vmatprep.subr.bf16.mxu0 %v3339_v27  ;;  %2531 = vmatprep.subr.bf16.mxu1 %v3341_v28  ;;  %v3396_v27 = vcombine.low %v839_v14, %v843_v16  ;;  %v3403_v28 = vcombine.high %v846_v21, %v850_v22  ;;  %v3405_v29 = vcombine.high %v847_v23, %v851_v25  ;;  %v906_v14 = vld [vmem:[%s4285_s8 + $0x7f0] sm:$0xff]  ;;  %v903_v16 = vld [vmem:[%s4285_s8 + $0x7d8] sm:$0xff] }
 0x18e   : > { %2441 = vmatmul.mubr.bf16.vlgmr.msra.gmra.mrb[4].mxu0 %v4432_v15  ;;  %2523 = vmatmul.mubr.bf16.vlgmr.msra.gmra.mrb[4].mxu1 %v4432_v15  ;;  %v3354_v15 = vcombine.low %v798_v36, %v802_v38  ;;  %v862_v38 = vld [vmem:[%s4285_s8 + $0x690] sm:$0xff] }
 0x18f   : > { %2450 = vmatpush1.bf16.msra.mxu0 %v3338_v37  ;;  %2532 = vmatpush1.bf16.msra.mxu1 %v3340_v33  ;;  %v859_v37 = vld [vmem:[%s4285_s8 + $0x678] sm:$0xff]  ;;  %v3402_v33 = vcombine.low %v846_v21, %v850_v22  ;;  %v3458_v22 = vcombine.low %v902_v13, %v906_v14 }
 0x190   : > { %2451 = vmatprep.subr.bf16.mxu0 %v3347_v34  ;;  %2533 = vmatprep.subr.bf16.mxu1 %v3349_v35  ;;  %v3404_v34 = vcombine.low %v847_v23, %v851_v25  ;;  %v3411_v35 = vcombine.high %v854_v30, %v858_v31  ;;  %v3413_v36 = vcombine.high %v855_v32, %v859_v37 }
 0x191   : > { %2481 = vmatprep.mubr.bf16.mxu0 %v4440_v24  ;;  %2563 = vmatprep.mubr.bf16.mxu1 %v4440_v24  ;;  %v3364_v24 = vcombine.low %v807_v47, %v811_v48  ;;  %v874_v47 = vld [vmem:[%s4285_s8 + $0x6f0] sm:$0xff]  ;;  %v871_v48 = vld [vmem:[%s4285_s8 + $0x6d8] sm:$0xff] }
 0x193   : > { %2452 = vmatpush1.bf16.msra.mxu0 %v3346_v41  ;;  %2534 = vmatpush1.bf16.msra.mxu1 %v3348_v42  ;;  %v867_v41 = vld [vmem:[%s4285_s8 + $0x6b8] sm:$0xff]  ;;  %v3410_v42 = vcombine.low %v854_v30, %v858_v31 }
 0x194   : > { %2453 = vmatprep.subr.bf16.mxu0 %v3355_v43  ;;  %2535 = vmatprep.subr.bf16.mxu1 %v3357_v44  ;;  %v3412_v43 = vcombine.low %v855_v32, %v859_v37  ;;  %v3419_v44 = vcombine.high %v862_v38, %v866_v39  ;;  %v3421_v45 = vcombine.high %v863_v40, %v867_v41  ;;  %v910_v37 = vlaneseq }
 0x197   : > { %2454 = vmatpush1.bf16.msra.mxu0 %v3354_v15  ;;  %2536 = vmatpush1.bf16.msra.mxu1 %v3356_v49  ;;  %v875_v15 = vld [vmem:[%s4285_s8 + $0x6f8] sm:$0xff]  ;;  %v3418_v49 = vcombine.low %v862_v38, %v866_v39 }
 0x198   : > { %2455 = vmatprep.subr.bf16.mxu0 %v3363_v50  ;;  %2537 = vmatprep.subr.bf16.mxu1 %v3365_v51  ;;  %v3420_v50 = vcombine.low %v863_v40, %v867_v41  ;;  %v3427_v51 = vcombine.high %v870_v46, %v874_v47  ;;  %v3429_v58 = vcombine.high %v871_v48, %v875_v15 }
 0x19b   : > { %2456 = vmatpush1.bf16.msra.mxu0 %v3362_v56  ;;  %2538 = vmatpush1.bf16.msra.mxu1 %v3364_v24  ;;  %v883_v56 = vld [vmem:[%s4285_s8 + $0x738] sm:$0xff]  ;;  %v3426_v24 = vcombine.low %v870_v46, %v874_v47 }
 0x19c   : > { %2457 = vmatprep.subr.bf16.mxu0 %v3371_v57  ;;  %2539 = vmatprep.subr.bf16.mxu1 %v3373_v59  ;;  %v3428_v57 = vcombine.low %v871_v48, %v875_v15  ;;  %v3435_v59 = vcombine.high %v878_v52, %v882_v53  ;;  %v3437_v60 = vcombine.high %v879_v55, %v883_v56 }
 0x19f   : > { %2458 = vmatpush1.bf16.msra.mxu0 %v3370_v0  ;;  %2540 = vmatpush1.bf16.msra.mxu1 %v3372_v1  ;;  %v891_v0 = vld [vmem:[%s4285_s8 + $0x778] sm:$0xff]  ;;  %v3434_v1 = vcombine.low %v878_v52, %v882_v53 }
 0x1a0   : > { %2459 = vmatprep.subr.bf16.mxu0 %v3379_v2  ;;  %2541 = vmatprep.subr.bf16.mxu1 %v3381_v3  ;;  %v3436_v2 = vcombine.low %v879_v55, %v883_v56  ;;  %v3443_v3 = vcombine.high %v886_v61, %v890_v62  ;;  %v3445_v4 = vcombine.high %v887_v63, %v891_v0 }
 0x1a3   : > { %2460 = vmatpush1.bf16.msra.mxu0 %v3378_v8  ;;  %2542 = vmatpush1.bf16.msra.mxu1 %v3380_v9  ;;  %v899_v8 = vld [vmem:[%s4285_s8 + $0x7b8] sm:$0xff]  ;;  %v3442_v9 = vcombine.low %v886_v61, %v890_v62 }
 0x1a4   : > { %2461 = vmatprep.subr.bf16.mxu0 %v3387_v10  ;;  %2543 = vmatprep.subr.bf16.mxu1 %v3389_v11  ;;  %v3444_v10 = vcombine.low %v887_v63, %v891_v0  ;;  %v3451_v11 = vcombine.high %v894_v5, %v898_v6  ;;  %v3453_v12 = vcombine.high %v895_v7, %v899_v8 }
 0x1a7   : > { %2462 = vmatpush1.bf16.msra.mxu0 %v3386_v17  ;;  %2544 = vmatpush1.bf16.msra.mxu1 %v3388_v18  ;;  %v907_v17 = vld [vmem:[%s4285_s8 + $0x7f8] sm:$0xff]  ;;  %v3450_v18 = vcombine.low %v894_v5, %v898_v6 }
 0x1a8   : > { %2463 = vmatprep.subr.bf16.mxu0 %v3395_v19  ;;  %2545 = vmatprep.subr.bf16.mxu1 %v3397_v20  ;;  %v3452_v19 = vcombine.low %v895_v7, %v899_v8  ;;  %v3459_v20 = vcombine.high %v902_v13, %v906_v14  ;;  %v3461_v21 = vcombine.high %v903_v16, %v907_v17 }
 0x1a9   : > { %v3460_v23 = vcombine.low %v903_v16, %v907_v17 }
 0x1ab   : > { %2464 = vmatpush1.bf16.msra.mxu0 %v3394_v26  ;;  %2546 = vmatpush1.bf16.msra.mxu1 %v3396_v27 }
 0x1ac   : > { %2465 = vmatprep.subr.bf16.mxu0 %v3403_v28  ;;  %2547 = vmatprep.subr.bf16.mxu1 %v3405_v29 }
 0x1af   : > { %2466 = vmatpush1.bf16.msra.mxu0 %v3402_v33  ;;  %2548 = vmatpush1.bf16.msra.mxu1 %v3404_v34  ;;  %v911_v33 = vshrl.u32 %v910_v37, 7 }
 0x1b0   : > { %2467 = vmatprep.subr.bf16.mxu0 %v3411_v35  ;;  %2549 = vmatprep.subr.bf16.mxu1 %v3413_v36  ;;  %v908_v35 = vld [vmem:[%s4292_s0] sm:$0xff] }
 0x1b1   : > { %v912_v34 = vsub.s32 0, %v911_v33  ;;  %v920_v36 = vsub.s32 2, %v911_v33  ;;  %v916_v38 = vsub.s32 1, %v911_v33  ;;  %v924_v39 = vsub.s32 3, %v911_v33 }
 0x1b2   : > { %v936_v53 = vsub.s32 6, %v911_v33  ;;  %v932_v55 = vsub.s32 5, %v911_v33 }
 0x1b3   : > { %2468 = vmatpush1.bf16.msra.mxu0 %v3410_v42  ;;  %2550 = vmatpush1.bf16.msra.mxu1 %v3412_v43  ;;  %v913_v40 = vrot.slane %v908_v35, %v912_v34  ;;  %v921_v41 = vrot.slane %v908_v35, %v920_v36  ;;  %v917_v42 = vrot.slane %v908_v35, %v916_v38 }
 0x1b4   : > { %2469 = vmatprep.subr.bf16.mxu0 %v3419_v44  ;;  %2551 = vmatprep.subr.bf16.mxu1 %v3421_v45  ;;  %v925_v43 = vrot.slane %v908_v35, %v924_v39  ;;  %v937_v63 = vrot.slane %v908_v35, %v936_v53  ;;  %v933_v0 = vrot.slane %v908_v35, %v932_v55 }
 0x1b7   : > { %2470 = vmatpush1.bf16.msra.mxu0 %v3418_v49  ;;  %2552 = vmatpush1.bf16.msra.mxu1 %v3420_v50 }
 0x1b8   : > { %2471 = vmatprep.subr.bf16.mxu0 %v3427_v51  ;;  %2553 = vmatprep.subr.bf16.mxu1 %v3429_v58  ;;  %v928_v58 = vsub.s32 4, %v911_v33 }
 0x1ba   : > { %v929_v61 = vrot.slane %v908_v35, %v928_v58 }
 0x1bb   : > { %2472 = vmatpush1.bf16.msra.mxu0 %v3426_v24  ;;  %2554 = vmatpush1.bf16.msra.mxu1 %v3428_v57  ;;  %v940_v57 = vsub.s32 7, %v911_v33 }
 0x1bc   : > { %2473 = vmatprep.subr.bf16.mxu0 %v3435_v59  ;;  %2555 = vmatprep.subr.bf16.mxu1 %v3437_v60 }
 0x1bf   : > { %2474 = vmatpush1.bf16.msra.mxu0 %v3434_v1  ;;  %2556 = vmatpush1.bf16.msra.mxu1 %v3436_v2  ;;  %v941_v1 = vrot.slane %v908_v35, %v940_v57 }
 0x1c0   : > { %2475 = vmatprep.subr.bf16.mxu0 %v3443_v3  ;;  %2557 = vmatprep.subr.bf16.mxu1 %v3445_v4 }
 0x1c3   : > { %2476 = vmatpush1.bf16.msra.mxu0 %v3442_v9  ;;  %2558 = vmatpush1.bf16.msra.mxu1 %v3444_v10 }
 0x1c4   : > { %2477 = vmatprep.subr.bf16.mxu0 %v3451_v11  ;;  %2559 = vmatprep.subr.bf16.mxu1 %v3453_v12 }
 0x1c7   : > { %2478 = vmatpush1.bf16.msra.mxu0 %v3450_v18  ;;  %2560 = vmatpush1.bf16.msra.mxu1 %v3452_v19 }
 0x1c8   : > { %2479 = vmatprep.subr.bf16.mxu0 %v3459_v20  ;;  %2561 = vmatprep.subr.bf16.mxu1 %v3461_v21  ;;  %v2610_v20 = vld [vmem:[%s4327_s18] sm:$0xff] }
 0x1cb   : > { %2480 = vmatpush1.bf16.msra.mxu0 %v3458_v22  ;;  %2562 = vmatpush1.bf16.msra.mxu1 %v3460_v23  ;;  %v2611_v22 = vld [vmem:[%s4327_s18 + $0x8] sm:$0xff] }
 0x1ce   : > { %2482 = vmatmul.mubr.bf16.vlgmr.msra.gmra.mrb[4].mxu0 %v4508_v54  ;;  %2564 = vmatmul.mubr.bf16.vlgmr.msra.gmra.mrb[4].mxu1 %v4508_v54 }
 0x221   : > { %v2319_v25 = vpop.f32.mrb[0].mxu0  ;;  %v2401_v26 = vpop.f32.mrb[0].mxu1 }
 0x222   : > { %v2321_v27 = vpop.f32.mrb[1].mxu0  ;;  %v2403_v28 = vpop.f32.mrb[1].mxu1  ;;  %v3521_v54 = vadd.f32 %v2319_v25, %v913_v40  ;;  %v3523_v44 = vadd.f32 %v2401_v26, %v921_v41 }
 0x223   : > { %v2323_v29 = vpop.f32.mrb[2].mxu0  ;;  %v2405_v30 = vpop.f32.mrb[2].mxu1  ;;  %v3522_v45 = vadd.f32 %v2321_v27, %v917_v42  ;;  %v3524_v46 = vadd.f32 %v2403_v28, %v925_v43 }
 0x224   : > { %v2324_v31 = vpop.f32.mrb[3].mxu0  ;;  %v2406_v32 = vpop.f32.mrb[3].mxu1  ;;  %v3462_v47 = vmul.f32 -1.442695, %v3521_v54  ;;  %v3464_v48 = vmul.f32 -1.442695, %v3523_v44 }
 0x225   : > { %v3463_v15 = vmul.f32 -1.442695, %v3522_v45  ;;  %v3465_v49 = vmul.f32 -1.442695, %v3524_v46 }
 0x226   : > { %3636 = vpow2.f32 %v3462_v47 }
 0x227   : > { %3638 = vpow2.f32 %v3464_v48 }
 0x228   : > { %3640 = vpow2.f32 %v3463_v15 }
 0x229   : > { %3642 = vpow2.f32 %v3465_v49 }
 0x230   : > { %v3637_v50 = vpop.eup %3636 }
 0x231   : > { %v3639_v51 = vpop.eup %3638  ;;  %v2584_v24 = vadd.f32 1.0, %v3637_v50 }
 0x232   : > { %v3641_v52 = vpop.eup %3640  ;;  %v2586_v59 = vadd.f32 1.0, %v3639_v51 }
 0x233   : > { %v3643_v56 = vpop.eup %3642  ;;  %v2585_v60 = vadd.f32 1.0, %v3641_v52  ;;  %3644 = vrcp.f32 %v2584_v24 }
 0x234   : > { %v2587_v62 = vadd.f32 1.0, %v3643_v56  ;;  %3646 = vrcp.f32 %v2586_v59 }
 0x235   : > { %3648 = vrcp.f32 %v2585_v60 }
 0x236   : > { %3650 = vrcp.f32 %v2587_v62 }
 0x23d   : > { %v3645_v17 = vpop.eup %3644 }
 0x23e   : > { %v3647_v18 = vpop.eup %3646 }
 0x23f   : > { %v3649_v19 = vpop.eup %3648  ;;  %v2612_v26 = vmul.f32 %v3647_v18, %v2610_v20 }
 0x240   : > { %v3651_v21 = vpop.eup %3650 }
 0x241   : > { %v2613_v28 = vmul.f32 %v3651_v21, %v2611_v22 }
 0x2a1   : > { %v2483_v2 = vpop.f32.mrb[4].mxu0  ;;  %v2565_v4 = vpop.f32.mrb[4].mxu1 }
 0x2a2   : > { %v3525_v3 = vadd.f32 %v2483_v2, %v929_v61  ;;  %v2485_v5 = vpop.f32.mrb[5].mxu0  ;;  %v3527_v6 = vadd.f32 %v2565_v4, %v937_v63  ;;  %v2567_v8 = vpop.f32.mrb[5].mxu1 }
 0x2a3   : > { %v3526_v7 = vadd.f32 %v2485_v5, %v933_v0  ;;  %v2487_v9 = vpop.f32.mrb[6].mxu0  ;;  %v3528_v10 = vadd.f32 %v2567_v8, %v941_v1  ;;  %v2569_v11 = vpop.f32.mrb[6].mxu1 }
 0x2a4   : > { %3652 = vtanh.f32 %v3525_v3  ;;  %v2488_v12 = vpop.f32.mrb[7].mxu0  ;;  %v3466_v13 = vmul.f32 -1.442695, %v3527_v6  ;;  %v2570_v14 = vpop.f32.mrb[7].mxu1 }
 0x2a5   : > { %3654 = vtanh.f32 %v3526_v7  ;;  %v3467_v16 = vmul.f32 -1.442695, %v3528_v10 }
 0x2a6   : > { %3656 = vpow2.f32 %v3466_v13 }
 0x2a7   : > { %3658 = vpow2.f32 %v3467_v16 }
 0x2ae   : > { %v3653_v23 = vpop.eup %3652 }
 0x2af   : > { %v3655_v25 = vpop.eup %3654  ;;  %v2614_v27 = vmul.f32 %v3653_v23, %v3645_v17 }
 0x2b0   : > { %v2615_v29 = vmul.f32 %v3655_v25, %v3649_v19  ;;  %v3657_v30 = vpop.eup %3656 }
 0x2b1   : > { %v2616_v31 = vadd.f32 %v2614_v27, %v2612_v26  ;;  %v3659_v32 = vpop.eup %3658  ;;  %v2604_v37 = vadd.f32 1.0, %v3657_v30 }
 0x2b2   : > { %v2617_v33 = vadd.f32 %v2615_v29, %v2613_v28  ;;  %v2605_v34 = vadd.f32 1.0, %v3659_v32 }
 0x2b3   : > { %3660 = vtanh.f32 %v2616_v31  ;;  %2622 = vst [vmem:[%s4337_s13] sm:$0xff] %v2616_v31 }
 0x2b4   : > { %3662 = vrcp.f32 %v2604_v37  ;;  %2623 = vst [vmem:[%s4337_s13 + $0x8] sm:$0xff] %v2617_v33 }
 0x2b5   : > { %3664 = vtanh.f32 %v2617_v33 }
 0x2b6   : > { %3666 = vrcp.f32 %v2605_v34 }
 0x2bd   : > { %v3661_v35 = vpop.eup %3660 }
 0x2be   : > { %v3663_v36 = vpop.eup %3662 }
 0x2bf   : > { %v3665_v38 = vpop.eup %3664  ;;  %v2620_v39 = vmul.f32 %v3663_v36, %v3661_v35 }
 0x2c0   : > { %v3667_v40 = vpop.eup %3666 }
 0x2c1   : > { %2624 = vst [vmem:[%s4332_s24] sm:$0xff] %v2620_v39  ;;  %v2621_v41 = vmul.f32 %v3667_v40, %v3665_v38 }
 0x2c3   : > { %2625 = vst [vmem:[%s4332_s24 + $0x8] sm:$0xff] %v2621_v41  ;;  %v3519_v42 = vpack.c.bf16 %v2621_v41, %v2620_v39 }
 0x2c5   : > { %2634 = vst [vmem:[#allocation2] sm:$0xff] %v3519_v42 }
 0x2c6 PF: > { %p3469_p2 = scmp.lt.s32.totalorder %s4037_s16, 2 }
 0x2c7   : > { %v3668_v43 = vld [vmem:[%s4302_s27 + $0x4] ss:$8 sps:$4 sm:$0xff] (!%p3469_p2)   ;;  %v3670_v54 = vld [vmem:[%s4302_s27] ss:$8 sps:$4 sm:$0xff] (!%p3469_p2)   ;;  %v3671_v44 = vld [vmem:[%s4302_s27 + $0x14] ss:$8 sps:$4 sm:$0xff] (!%p3469_p2)   ;;  %v2674_v12 = vlaneseq (!%p3469_p2) }
 0x2c8   : > { %2638 = sbr.rel (%p3469_p2) target bundleno = 992 (0x3e0), region = 76  ;;  %2851 = vmatprep.subr.bf16.mxu0 (!%p3469_p2), %v3668_v43  ;;  %v3673_v45 = vld [vmem:[%s4302_s27 + $0x10] ss:$8 sps:$4 sm:$0xff] (!%p3469_p2)   ;;  %v3674_v46 = vld [vmem:[%s4302_s27 + $0x24] ss:$8 sps:$4 sm:$0xff] (!%p3469_p2)  }
 0x2c9   : > { %2852 = vmatpush1.bf16.msra.mxu0 (!%p3469_p2), %v3670_v54  ;;  %v3676_v47 = vld [vmem:[%s4302_s27 + $0x20] ss:$8 sps:$4 sm:$0xff] (!%p3469_p2)   ;;  %v3677_v48 = vld [vmem:[%s4302_s27 + $0x34] ss:$8 sps:$4 sm:$0xff] (!%p3469_p2)   ;;  %v3679_v15 = vld [vmem:[%s4302_s27 + $0x30] ss:$8 sps:$4 sm:$0xff] (!%p3469_p2)  }
 0x2ca   : > { %2853 = vmatprep.subr.bf16.mxu0 (!%p3469_p2), %v3671_v44  ;;  %v3680_v49 = vld [vmem:[%s4302_s27 + $0x44] ss:$8 sps:$4 sm:$0xff] (!%p3469_p2)   ;;  %v3682_v50 = vld [vmem:[%s4302_s27 + $0x40] ss:$8 sps:$4 sm:$0xff] (!%p3469_p2)   ;;  %v3683_v51 = vld [vmem:[%s4302_s27 + $0x54] ss:$8 sps:$4 sm:$0xff] (!%p3469_p2)  }
 0x2cb   : > { %v3685_v58 = vld [vmem:[%s4302_s27 + $0x50] ss:$8 sps:$4 sm:$0xff] (!%p3469_p2)   ;;  %v3686_v52 = vld [vmem:[%s4302_s27 + $0x64] ss:$8 sps:$4 sm:$0xff] (!%p3469_p2)   ;;  %v3688_v56 = vld [vmem:[%s4302_s27 + $0x60] ss:$8 sps:$4 sm:$0xff] (!%p3469_p2)  }
 0x2cc   : > { %v2639_v53 = vld [vmem:[#allocation2] sm:$0xff] (!%p3469_p2)  ;;  %v3689_v24 = vld [vmem:[%s4302_s27 + $0x74] ss:$8 sps:$4 sm:$0xff] (!%p3469_p2)   ;;  %v3691_v57 = vld [vmem:[%s4302_s27 + $0x70] ss:$8 sps:$4 sm:$0xff] (!%p3469_p2)   ;;  %v2675_v13 = vshrl.u32 (!%p3469_p2), %v2674_v12, 7 }
 0x2cd   : > { %2854 = vmatpush1.bf16.msra.mxu0 (!%p3469_p2), %v3673_v45  ;;  %v3471_v55 = vcombine.high (!%p3469_p2), %v2639_v53, %v2639_v53  ;;  %v3692_v59 = vld [vmem:[%s4302_s27 + $0x84] ss:$8 sps:$4 sm:$0xff] (!%p3469_p2)   ;;  %v3694_v60 = vld [vmem:[%s4302_s27 + $0x80] ss:$8 sps:$4 sm:$0xff] (!%p3469_p2)   ;;  %v3695_v61 = vld [vmem:[%s4302_s27 + $0x94] ss:$8 sps:$4 sm:$0xff] (!%p3469_p2)   ;;  %v3470_v11 = vcombine.low (!%p3469_p2), %v2639_v53, %v2639_v53 }
 0x2ce   : > { %2855 = vmatprep.subr.bf16.mxu0 (!%p3469_p2), %v3674_v46  ;;  %v3697_v62 = vld [vmem:[%s4302_s27 + $0x90] ss:$8 sps:$4 sm:$0xff] (!%p3469_p2)   ;;  %v3698_v63 = vld [vmem:[%s4302_s27 + $0xa4] ss:$8 sps:$4 sm:$0xff] (!%p3469_p2)   ;;  %v3700_v0 = vld [vmem:[%s4302_s27 + $0xa0] ss:$8 sps:$4 sm:$0xff] (!%p3469_p2)  }
 0x2cf   : > { %2883 = vmatprep.mubr.bf16.mxu0 %v3471_v55  ;;  %v3701_v1 = vld [vmem:[%s4302_s27 + $0xb4] ss:$8 sps:$4 sm:$0xff]   ;;  %v3703_v2 = vld [vmem:[%s4302_s27 + $0xb0] ss:$8 sps:$4 sm:$0xff]   ;;  %v3704_v3 = vld [vmem:[%s4302_s27 + $0xc4] ss:$8 sps:$4 sm:$0xff]  }
 0x2d0   : > { %v3706_v4 = vld [vmem:[%s4302_s27 + $0xc0] ss:$8 sps:$4 sm:$0xff]   ;;  %v3707_v5 = vld [vmem:[%s4302_s27 + $0xd4] ss:$8 sps:$4 sm:$0xff]   ;;  %v3709_v6 = vld [vmem:[%s4302_s27 + $0xd0] ss:$8 sps:$4 sm:$0xff]  }
 0x2d1   : > { %2856 = vmatpush1.bf16.msra.mxu0 %v3676_v47  ;;  %v3710_v7 = vld [vmem:[%s4302_s27 + $0xe4] ss:$8 sps:$4 sm:$0xff]   ;;  %v3712_v8 = vld [vmem:[%s4302_s27 + $0xe0] ss:$8 sps:$4 sm:$0xff]   ;;  %v3713_v9 = vld [vmem:[%s4302_s27 + $0xf4] ss:$8 sps:$4 sm:$0xff]  }
 0x2d2   : > { %2857 = vmatprep.subr.bf16.mxu0 %v3677_v48  ;;  %v3715_v10 = vld [vmem:[%s4302_s27 + $0xf0] ss:$8 sps:$4 sm:$0xff]   ;;  %v2676_v14 = vsub.s32 0, %v2675_v13  ;;  %v2672_v16 = vld [vmem:[%s4310_s23] sm:$0x3]  ;;  %v2680_v17 = vsub.s32 1, %v2675_v13 }
 0x2d4   : > { %v2677_v18 = vrot.slane %v2672_v16, %v2676_v14  ;;  %v2681_v19 = vrot.slane %v2672_v16, %v2680_v17 }
 0x2d5   : > { %2858 = vmatpush1.bf16.msra.mxu0 %v3679_v15 }
 0x2d6   : > { %2859 = vmatprep.subr.bf16.mxu0 %v3680_v49 }
 0x2d9   : > { %2860 = vmatpush1.bf16.msra.mxu0 %v3682_v50 }
 0x2da   : > { %2861 = vmatprep.subr.bf16.mxu0 %v3683_v51 }
 0x2dd   : > { %2862 = vmatpush1.bf16.msra.mxu0 %v3685_v58 }
 0x2de   : > { %2863 = vmatprep.subr.bf16.mxu0 %v3686_v52 }
 0x2e1   : > { %2864 = vmatpush1.bf16.msra.mxu0 %v3688_v56 }
 0x2e2   : > { %2865 = vmatprep.subr.bf16.mxu0 %v3689_v24 }
 0x2e5   : > { %2866 = vmatpush1.bf16.msra.mxu0 %v3691_v57 }
 0x2e6   : > { %2867 = vmatprep.subr.bf16.mxu0 %v3692_v59 }
 0x2e9   : > { %2868 = vmatpush1.bf16.msra.mxu0 %v3694_v60 }
 0x2ea   : > { %2869 = vmatprep.subr.bf16.mxu0 %v3695_v61 }
 0x2ed   : > { %2870 = vmatpush1.bf16.msra.mxu0 %v3697_v62 }
 0x2ee   : > { %2871 = vmatprep.subr.bf16.mxu0 %v3698_v63 }
 0x2f1   : > { %2872 = vmatpush1.bf16.msra.mxu0 %v3700_v0 }
 0x2f2   : > { %2873 = vmatprep.subr.bf16.mxu0 %v3701_v1 }
 0x2f5   : > { %2874 = vmatpush1.bf16.msra.mxu0 %v3703_v2 }
 0x2f6   : > { %2875 = vmatprep.subr.bf16.mxu0 %v3704_v3 }
 0x2f9   : > { %2876 = vmatpush1.bf16.msra.mxu0 %v3706_v4 }
 0x2fa   : > { %2877 = vmatprep.subr.bf16.mxu0 %v3707_v5 }
 0x2fd   : > { %2878 = vmatpush1.bf16.msra.mxu0 %v3709_v6 }
 0x2fe   : > { %2879 = vmatprep.subr.bf16.mxu0 %v3710_v7 }
 0x301   : > { %2880 = vmatpush1.bf16.msra.mxu0 %v3712_v8 }
 0x302   : > { %2881 = vmatprep.subr.bf16.mxu0 %v3713_v9 }
 0x305   : > { %2882 = vmatpush1.bf16.msra.mxu0 %v3715_v10 }
 0x308   : > { %2884 = vmatmul.mubr.bf16.vlgmr.msra.gmra.mrb[0].mxu0 %v3470_v11 }
 0x3db   : > { %v2885_v20 = vpop.f32.mrb[0].mxu0 }
 0x3dc   : > { %v2886_v21 = vadd.f32 %v2885_v20, %v2677_v18  ;;  %v2887_v22 = vpop.f32.mrb[1].mxu0 }
 0x3dd   : > { %v2888_v23 = vadd.f32 %v2887_v22, %v2681_v19  ;;  %v2889_v25 = vpop.f32.mrb[2].mxu0 }
 0x3de   : > { %2892 = vst [vmem:[%s4339_s21] sm:$0xff] %v2886_v21  ;;  %v2890_v26 = vpop.f32.mrb[3].mxu0 }
 0x3df   : > { %2893 = vst [vmem:[%s4339_s21 + $0x8] sm:$0xff] %v2888_v23 }
 0x3e0 PF: > { %s4793_s6 = sld [smem:[#allocation21_spill]]  ;;  %s3505_s13 = sadd.s32 4294967294, %s4037_s16 }
 0x3e1   : > { %p2917_p0 = scmp.gt.s32.totalorder %s3505_s13, 0  ;;  %s2926_s8 = sshll.u32 %s4339_s21, 4  ;;  %s4687_s8 = int_to_ptr.vmem [resolvable:$true] %s2926_s8 }
 0x3e2   : > { %s4794_s26 = sld [smem:[#allocation27_spill]]  ;;  %s2895_s5 = scalar_lea.sflag [#allocation5], %s4299_s7 }
 0x3e3   : > { %s4812_s13 = smov (!%p2917_p0, %s3505_s13), 0  ;;  %s3840_s9 = scalar_lea.vmem %s4687_s8, 256 }
 0x3e4   : > { %s3520_s0 = sshll.u32 %s4812_s13, 8  ;;  %p3841_p6 = scmp.ne.s32.totalorder %s4687_s8, %s3840_s9 }
 0x3e5   : > { %s3952_s16 = smov [#allocation11]  }
 0x3e6   : > { %p4795_p9 = scmp.ne.s32.totalorder %s4793_s6, 0  ;;  %s3844_s18 = sshll.u32 %s3952_s16, 4  ;;  %s3845_s18 = int_to_ptr.vmem [resolvable:$false] %s3844_s18 }
 0x3e7   : > { %s3846_s28 = scalar_lea.vmem %s3845_s18, 512  ;;  %p3847_p4 = scmp.lt.s32.totalorder %s4687_s8, %s3845_s18 }
 0x3e8   : > { %s2924_s20 = scalar_lea.hbm %s4794_s26, %s3520_s0  ;;  %p3842_p12 = pnand %p3841_p6, %p4795_p9 }
 0x3e9   : > { %p3848_p7 = scmp.lt.s32.totalorder %s3846_s28, %s3840_s9 }
 0x3ea   : > { %p3843_p10 = pneg %p3842_p12 }
 0x3eb   : > { %p3849_p5 = por %p3848_p7, %p3847_p4 }
 0x3ed   : > { %p3850_p13 = pnand %p3849_p5, %p3843_p10 }
 0x3ef   : > { %3853 = shalt.err (!%p3850_p13)
}
 0x3f0   : > { %s3854_s22 = scalar_lea.hbm %s2924_s20, 256  ;;  %s3858_s24 = scalar_lea.hbm %s4794_s26, 256 }
 0x3f1   : > { %p3855_p8 = scmp.ne.s32.totalorder %s2924_s20, %s3854_s22  ;;  %p3859_p3 = scmp.lt.u32.totalorder %s2924_s20, %s4794_s26 }
 0x3f2   : > { %p3860_p2 = scmp.lt.u32.totalorder %s3858_s24, %s3854_s22  ;;  %p3862_p6 = scmp.lt.u32.totalorder %s3854_s22, %s2924_s20 }
 0x3f3   : > { %p3856_p11 = pnand %p3855_p8, %p4795_p9 }
 0x3f4   : > { %p3861_p0 = por %p3860_p2, %p3859_p3 }
 0x3f5   : > { %p3857_p1 = pneg %p3856_p11 }
 0x3f6   : > { %p3863_p12 = por %p3862_p6, %p3861_p0 }
 0x3f8   : > { %p3864_p10 = pnand %p3863_p12, %p3857_p1 }
 0x3fa   : > { %3867 = shalt.err (!%p3864_p10)
}
 0x3fb   : > { %3553 = dma.vmem_to_hbm [thread:$0]  (%p4795_p9), %s4687_s8, 256, %s2924_s20, %s2895_s5  }
 0x3fc PF: > { %p3573_p4 = scmp.ge.s32.totalorder %s3942_s15, 2  ;;  %s2948_s21 = sand.u32 1, %s3918_s30  }
 0x3fd   : > { %p4796_p7 = scmp.ne.s32.totalorder %s4783_s14, 0  ;;  %s2949_s4 = scalar_lea.sflag [#allocation5], %s2948_s21 }
 0x3ff   : > { %p3569_p5 = pnand %p3573_p4, %p4796_p7 }
 0x401   : > { %3913 = dma.done.wait (!%p3569_p5), %s2949_s4, 256  }
 0x402   : > { %3915 = vsyncadd (!%p3569_p5), %s2949_s4, 4294967040  ;;  %s4797_s15 = sld [smem:[#allocation19_spill]]  ;;  %s4798_s29 = sld [smem:[#allocation17_spill]] }
 0x403   : > { %s4799_s13 = sld [smem:[#allocation18_spill]]  ;;  %s4800_s14 = sld [smem:[#allocation20_spill]] }
 0x404   : > { %s4801_s30 = smov %s3922_s10  ;;  %s4802_s10 = smov %s3926_s11 }
 0x405   : > { %s4803_s11 = smov %s4225_s12 }
 0x408   : > { %p29_p9 = scmp.ge.s32.totalorder %s4797_s15, 5   ;;  %s4804_s12 = smov %s4798_s29 }
 0x40a   :  { %31 = sbr.rel (!%p29_p9) target bundleno = 20 (0x14), region = 172 }
 0x411   :  { %2974 = vsyncpa [#allocation4], 1 }
 0x412   :  { %2976 = vsyncpa [#allocation4 + $0x1], 1 }
 0x413   :  { %2977 = vsyncpa [#allocation7], 1 }
 0x414   :  { %2979 = vsyncpa [#allocation7 + $0x1], 1 }
 0x415   :  { %2980 = vsyncpa [#allocation10], 1 }
 0x416   :  { %2982 = vsyncpa [#allocation10 + $0x1], 1 }
 0x417   :  { %2983 = vsyncpa [#allocation5], 1 }
 0x418   :  { %2985 = vsyncpa [#allocation5 + $0x1], 1 }

</bundles_post_ra>
